<compile_context>
chip_gen: v7x
topology: tpu7x:2x2x1
jax: 0.10.0
libtpu: 0.0.40
codegen_flags: <defaults>
</compile_context>

<pallas_src>
import jax
import jax.numpy as jnp
from jax.experimental import pallas as pl
from jax.experimental.pallas import tpu as pltpu

# ---------------- model dims (small, consistent with the module) -------------
B = 2          # batch
C = 32         # channels
RED = 16       # reduction
H = C // RED   # hidden = 2
T = 128        # sequence length (lane-friendly, multiple of 128)
KS = 7         # spatial conv kernel size
PAD = KS // 2  # = 3


def cbam1d_kernel(x_ref, w1_ref, w2_ref, wsp_ref, o_ref):
    # x_ref:   (B, C, T) VMEM f32   -- whole batch in one block
    # w1_ref:  (H, C)    VMEM f32   -- Linear(C, H).weight, as-is
    # w2_ref:  (C, H)    VMEM f32   -- Linear(H, C).weight, as-is
    # wsp_ref: (2*KS,)   SMEM f32   -- Conv1d(2,1,KS).weight[0] flattened
    # o_ref:   (B, C, T) VMEM
    _, c, t = x_ref.shape
    ks = wsp_ref.shape[0] // 2
    pad = ks // 2

    x = x_ref[...]                                              # (B, C, T) f32

    # ---------------- channel attention (VPU/XLU only, no MXU) ---------------
    avg_c = jnp.sum(x, axis=2) * (1.0 / t)                      # (B, C)
    max_c = jnp.max(x, axis=2)                                  # (B, C)

    w1 = w1_ref[...]                                            # (H, C)
    w2 = w2_ref[...]                                            # (C, H)

    # layer 1: contract over C   (B,1,C)*(1,H,C) -> lane-reduce -> (B, H)
    pre_a = jnp.sum(avg_c[:, None, :] * w1[None, :, :], axis=2)
    pre_m = jnp.sum(max_c[:, None, :] * w1[None, :, :], axis=2)
    # relu(pre_a)+relu(pre_m) before the (linear) second layer == mlp(a)+mlp(m)
    hid = jnp.maximum(pre_a, 0.0) + jnp.maximum(pre_m, 0.0)     # (B, H)
    # layer 2: contract over H   (B,1,H)*(1,C,H) -> lane-reduce -> (B, C)
    mlp_out = jnp.sum(hid[:, None, :] * w2[None, :, :], axis=2)

    x = x * jax.nn.sigmoid(mlp_out)[:, :, None]                 # channel-scaled x

    # ---------------- spatial attention --------------------------------------
    avg_sp = jnp.sum(x, axis=1, keepdims=True) * (1.0 / c)      # (B, 1, T)
    max_sp = jnp.max(x, axis=1, keepdims=True)                  # (B, 1, T)
    sp = jnp.concatenate([avg_sp, max_sp], axis=1)              # (B, 2, T)

    lane = jax.lax.broadcasted_iota(jnp.int32, (1, 1, t), 2)    # static lane idx
    conv = jnp.zeros_like(avg_sp)                               # (B, 1, T)
    for k in range(ks):                                         # ks = 7, unrolled
        d = k - pad                                             # static tap offset
        # one roll per tap (avg + max share it): rolled[i] = src[i + d]
        r = sp if d == 0 else pltpu.roll(sp, shift=(-d) % t, axis=2)
        tap = wsp_ref[k] * r[:, 0:1, :] + wsp_ref[ks + k] * r[:, 1:2, :]
        if d < 0:                                               # zero-pad left edge
            tap = jnp.where(lane >= -d, tap, 0.0)
        elif d > 0:                                             # zero-pad right edge
            tap = jnp.where(lane < t - d, tap, 0.0)
        conv = conv + tap

    o_ref[...] = (x * jax.nn.sigmoid(conv)).astype(o_ref.dtype)


@jax.jit
def cbam1d_pallas(x, w1, w2, w_sp):
    # x: (B, C, T) f32
    # w1: (H, C)  = Linear(C, H).weight ; w2: (C, H) = Linear(H, C).weight
    # w_sp: (2, KS) = Conv1d(2, 1, KS).weight[0]
    b, c, t = x.shape
    hh = w1.shape[0]
    w_sp_flat = w_sp.reshape(-1)          # (2*KS,) — contiguous, fuses under jit
    return pl.pallas_call(
        cbam1d_kernel,
        out_shape=jax.ShapeDtypeStruct((b, c, t), x.dtype),
        grid_spec=pltpu.PrefetchScalarGridSpec(
            num_scalar_prefetch=0,
            grid=(1,),                                           # whole problem in one step
            in_specs=[
                pl.BlockSpec((b, c, t), lambda i: (0, 0, 0)),          # x
                pl.BlockSpec((hh, c), lambda i: (0, 0)),               # w1 (as-is)
                pl.BlockSpec((c, hh), lambda i: (0, 0)),               # w2 (as-is)
                pl.BlockSpec(memory_space=pltpu.MemorySpace.SMEM),     # conv taps
            ],
            out_specs=pl.BlockSpec((b, c, t), lambda i: (0, 0, 0)),
        ),
        compiler_params=pltpu.CompilerParams(
            dimension_semantics=("arbitrary",)),
        cost_estimate=pl.CostEstimate(
            flops=20 * b * c * t,
            transcendentals=b * (c + t),
            bytes_accessed=8 * b * c * t),
    )(x, w1, w2, w_sp_flat)


def cbam1d_ref(x, w1, w2, w_sp):
    """Pure-JAX reference matching the PyTorch forward (all layers bias=False)."""
    avg = x.mean(-1)                                            # (B, C)
    mx = x.max(-1)                                              # (B, C)

    def mlp(v):
        return jnp.maximum(v @ w1.T, 0.0) @ w2.T

    scale_ch = jax.nn.sigmoid(mlp(avg) + mlp(mx))[:, :, None]
    x = x * scale_ch
    avg_sp = x.mean(axis=1, keepdims=True)
    max_sp = x.max(axis=1, keepdims=True)
    cat = jnp.concatenate([avg_sp, max_sp], axis=1)             # (B, 2, T)
    conv = jax.lax.conv_general_dilated(
        cat, w_sp[None], window_strides=(1,), padding=[(PAD, PAD)],
        dimension_numbers=("NCH", "OIH", "NCH"))                # (B, 1, T)
    return x * jax.nn.sigmoid(conv)


if __name__ == "__main__":
    key = jax.random.PRNGKey(0)
    kx, k1, k2, k3 = jax.random.split(key, 4)

    x = jax.random.normal(kx, (B, C, T), dtype=jnp.float32)
    # deterministic parameter init (shapes match nn.Linear / nn.Conv1d weights)
    w1 = jax.random.normal(k1, (H, C), dtype=jnp.float32) * 0.2     # Linear(C, H).weight
    w2 = jax.random.normal(k2, (C, H), dtype=jnp.float32) * 0.2     # Linear(H, C).weight
    w_sp = jax.random.normal(k3, (2, KS), dtype=jnp.float32) * 0.2  # Conv1d(2,1,7).weight[0]

    out = jax.block_until_ready(cbam1d_pallas(x, w1, w2, w_sp))

    ref = cbam1d_ref(x, w1, w2, w_sp)
    assert out.shape == (B, C, T)
    assert jnp.allclose(out, ref, atol=1e-5, rtol=1e-5), "mismatch vs reference"

    print("KERNEL_OK")
</pallas_src>

<mosaic_0001>
module attributes {stable_mosaic.version = 11 : i64} {
  func.func @cbam1d_kernel(%arg0: i32, %arg1: memref<2x32x128xf32, #tpu.memory_space<vmem>>, %arg2: memref<2x32xf32, #tpu.memory_space<vmem>>, %arg3: memref<32x2xf32, #tpu.memory_space<vmem>>, %arg4: memref<14xf32, #tpu.memory_space<smem>>, %arg5: memref<2x32x128xf32, #tpu.memory_space<vmem>>) attributes {dimension_semantics = [#tpu.dimension_semantics<arbitrary>], iteration_bounds = array<i64: 1>, scalar_prefetch = 0 : i64, scratch_operands = 0 : i64, tpu.core_type = #tpu.core_type<tc>, window_params = [{pipeline_mode = #tpu.pipeline_mode<synchronous>, transform_indices = @transform_0, window_bounds = array<i64: 2, 32, 128>}, {pipeline_mode = #tpu.pipeline_mode<synchronous>, transform_indices = @transform_1, window_bounds = array<i64: 2, 32>}, {pipeline_mode = #tpu.pipeline_mode<synchronous>, transform_indices = @transform_2, window_bounds = array<i64: 32, 2>}, {transform_indices = @transform_3, window_bounds = array<i64: 14>}, {pipeline_mode = #tpu.pipeline_mode<synchronous>, transform_indices = @transform_4, window_bounds = array<i64: 2, 32, 128>}]} {
    %c0 = arith.constant 0 : index
    %c0_0 = arith.constant 0 : index
    %c0_1 = arith.constant 0 : index
    %0 = vector.load %arg1[%c0, %c0_0, %c0_1] : memref<2x32x128xf32, #tpu.memory_space<vmem>>, vector<2x32x128xf32>
    %cst = arith.constant dense<0.000000e+00> : vector<2x32xf32>
    %1 = vector.multi_reduction <add>, %0, %cst [2] : vector<2x32x128xf32> to vector<2x32xf32>
    %cst_2 = arith.constant 7.812500e-03 : f32
    %2 = vector.broadcast %cst_2 : f32 to vector<2x32xf32>
    %3 = arith.mulf %1, %2 : vector<2x32xf32>
    %cst_3 = arith.constant dense<0xFF800000> : vector<2x32xf32>
    %4 = vector.multi_reduction <maximumf>, %0, %cst_3 [2] : vector<2x32x128xf32> to vector<2x32xf32>
    %c0_4 = arith.constant 0 : index
    %c0_5 = arith.constant 0 : index
    %5 = vector.load %arg2[%c0_4, %c0_5] : memref<2x32xf32, #tpu.memory_space<vmem>>, vector<2x32xf32>
    %c0_6 = arith.constant 0 : index
    %c0_7 = arith.constant 0 : index
    %6 = vector.load %arg3[%c0_6, %c0_7] : memref<32x2xf32, #tpu.memory_space<vmem>>, vector<32x2xf32>
    %7 = vector.shape_cast %3 : vector<2x32xf32> to vector<2x1x32xf32>
    %8 = vector.shape_cast %5 : vector<2x32xf32> to vector<1x2x32xf32>
    %9 = vector.broadcast %7 : vector<2x1x32xf32> to vector<2x2x32xf32>
    %10 = vector.broadcast %8 : vector<1x2x32xf32> to vector<2x2x32xf32>
    %11 = arith.mulf %9, %10 : vector<2x2x32xf32>
    %cst_8 = arith.constant dense<0.000000e+00> : vector<2x2xf32>
    %12 = vector.multi_reduction <add>, %11, %cst_8 [2] : vector<2x2x32xf32> to vector<2x2xf32>
    %13 = vector.shape_cast %4 : vector<2x32xf32> to vector<2x1x32xf32>
    %14 = vector.shape_cast %5 : vector<2x32xf32> to vector<1x2x32xf32>
    %15 = vector.broadcast %13 : vector<2x1x32xf32> to vector<2x2x32xf32>
    %16 = vector.broadcast %14 : vector<1x2x32xf32> to vector<2x2x32xf32>
    %17 = arith.mulf %15, %16 : vector<2x2x32xf32>
    %cst_9 = arith.constant dense<0.000000e+00> : vector<2x2xf32>
    %18 = vector.multi_reduction <add>, %17, %cst_9 [2] : vector<2x2x32xf32> to vector<2x2xf32>
    %cst_10 = arith.constant 0.000000e+00 : f32
    %19 = vector.broadcast %cst_10 : f32 to vector<2x2xf32>
    %20 = arith.maximumf %12, %19 : vector<2x2xf32>
    %cst_11 = arith.constant 0.000000e+00 : f32
    %21 = vector.broadcast %cst_11 : f32 to vector<2x2xf32>
    %22 = arith.maximumf %18, %21 : vector<2x2xf32>
    %23 = arith.addf %20, %22 : vector<2x2xf32>
    %24 = vector.shape_cast %23 : vector<2x2xf32> to vector<2x1x2xf32>
    %25 = vector.shape_cast %6 : vector<32x2xf32> to vector<1x32x2xf32>
    %26 = vector.broadcast %24 : vector<2x1x2xf32> to vector<2x32x2xf32>
    %27 = vector.broadcast %25 : vector<1x32x2xf32> to vector<2x32x2xf32>
    %28 = arith.mulf %26, %27 : vector<2x32x2xf32>
    %cst_12 = arith.constant dense<0.000000e+00> : vector<2x32xf32>
    %29 = vector.multi_reduction <add>, %28, %cst_12 [2] : vector<2x32x2xf32> to vector<2x32xf32>
    %30 = arith.negf %29 : vector<2x32xf32>
    %31 = math.exp %30 : vector<2x32xf32>
    %cst_13 = arith.constant 1.000000e+00 : f32
    %32 = vector.broadcast %cst_13 : f32 to vector<2x32xf32>
    %33 = arith.addf %32, %31 : vector<2x32xf32>
    %34 = arith.divf %32, %33 : vector<2x32xf32>
    %35 = vector.shape_cast %34 : vector<2x32xf32> to vector<2x32x1xf32>
    %36 = vector.broadcast %35 : vector<2x32x1xf32> to vector<2x32x128xf32>
    %37 = arith.mulf %0, %36 : vector<2x32x128xf32>
    %cst_14 = arith.constant dense<0.000000e+00> : vector<2x128xf32>
    %38 = vector.multi_reduction <add>, %37, %cst_14 [1] : vector<2x32x128xf32> to vector<2x128xf32>
    %39 = vector.shape_cast %38 : vector<2x128xf32> to vector<2x1x128xf32>
    %cst_15 = arith.constant 3.125000e-02 : f32
    %40 = vector.broadcast %cst_15 : f32 to vector<2x1x128xf32>
    %41 = arith.mulf %39, %40 : vector<2x1x128xf32>
    %cst_16 = arith.constant dense<0xFF800000> : vector<2x128xf32>
    %42 = vector.multi_reduction <maximumf>, %37, %cst_16 [1] : vector<2x32x128xf32> to vector<2x128xf32>
    %43 = vector.shape_cast %42 : vector<2x128xf32> to vector<2x1x128xf32>
    %44 = tpu.concatenate %41, %43 in 1 : vector<2x1x128xf32>, vector<2x1x128xf32> -> vector<2x2x128xf32>
    %45 = tpu.iota {dimensions = array<i32: 2>} : vector<1x1x128xi32>
    %cst_17 = arith.constant 0.000000e+00 : f32
    %46 = vector.broadcast %cst_17 : f32 to vector<2x1x128xf32>
    %c3_i32 = arith.constant 3 : i32
    %47 = tpu.dynamic_rotate %44 by %c3_i32 dim 2 : vector<2x2x128xf32>, i32 -> vector<2x2x128xf32>
    %c0_18 = arith.constant 0 : index
    %48 = memref.load %arg4[%c0_18] : memref<14xf32, #tpu.memory_space<smem>>
    %49 = vector.extract_strided_slice %47 {offsets = [0, 0, 0], sizes = [2, 1, 128], strides = [1, 1, 1]} : vector<2x2x128xf32> to vector<2x1x128xf32>
    %50 = vector.broadcast %48 : f32 to vector<2x1x128xf32>
    %51 = arith.mulf %50, %49 : vector<2x1x128xf32>
    %c7 = arith.constant 7 : index
    %52 = memref.load %arg4[%c7] : memref<14xf32, #tpu.memory_space<smem>>
    %53 = vector.extract_strided_slice %47 {offsets = [0, 1, 0], sizes = [2, 1, 128], strides = [1, 1, 1]} : vector<2x2x128xf32> to vector<2x1x128xf32>
    %54 = vector.broadcast %52 : f32 to vector<2x1x128xf32>
    %55 = arith.mulf %54, %53 : vector<2x1x128xf32>
    %56 = arith.addf %51, %55 : vector<2x1x128xf32>
    %c3_i32_19 = arith.constant 3 : i32
    %57 = vector.broadcast %c3_i32_19 : i32 to vector<1x1x128xi32>
    %58 = arith.cmpi sge, %45, %57 : vector<1x1x128xi32>
    %cst_20 = arith.constant 0.000000e+00 : f32
    %59 = vector.shape_cast %58 : vector<1x1x128xi1> to vector<1x1x128xi1>
    %60 = vector.broadcast %59 : vector<1x1x128xi1> to vector<2x1x128xi1>
    %61 = vector.broadcast %cst_20 : f32 to vector<2x1x128xf32>
    %62 = arith.select %60, %56, %61 : vector<2x1x128xi1>, vector<2x1x128xf32>
    %63 = arith.addf %46, %62 : vector<2x1x128xf32>
    %c2_i32 = arith.constant 2 : i32
    %64 = tpu.dynamic_rotate %44 by %c2_i32 dim 2 : vector<2x2x128xf32>, i32 -> vector<2x2x128xf32>
    %c1 = arith.constant 1 : index
    %65 = memref.load %arg4[%c1] : memref<14xf32, #tpu.memory_space<smem>>
    %66 = vector.extract_strided_slice %64 {offsets = [0, 0, 0], sizes = [2, 1, 128], strides = [1, 1, 1]} : vector<2x2x128xf32> to vector<2x1x128xf32>
    %67 = vector.broadcast %65 : f32 to vector<2x1x128xf32>
    %68 = arith.mulf %67, %66 : vector<2x1x128xf32>
    %c8 = arith.constant 8 : index
    %69 = memref.load %arg4[%c8] : memref<14xf32, #tpu.memory_space<smem>>
    %70 = vector.extract_strided_slice %64 {offsets = [0, 1, 0], sizes = [2, 1, 128], strides = [1, 1, 1]} : vector<2x2x128xf32> to vector<2x1x128xf32>
    %71 = vector.broadcast %69 : f32 to vector<2x1x128xf32>
    %72 = arith.mulf %71, %70 : vector<2x1x128xf32>
    %73 = arith.addf %68, %72 : vector<2x1x128xf32>
    %c2_i32_21 = arith.constant 2 : i32
    %74 = vector.broadcast %c2_i32_21 : i32 to vector<1x1x128xi32>
    %75 = arith.cmpi sge, %45, %74 : vector<1x1x128xi32>
    %cst_22 = arith.constant 0.000000e+00 : f32
    %76 = vector.shape_cast %75 : vector<1x1x128xi1> to vector<1x1x128xi1>
    %77 = vector.broadcast %76 : vector<1x1x128xi1> to vector<2x1x128xi1>
    %78 = vector.broadcast %cst_22 : f32 to vector<2x1x128xf32>
    %79 = arith.select %77, %73, %78 : vector<2x1x128xi1>, vector<2x1x128xf32>
    %80 = arith.addf %63, %79 : vector<2x1x128xf32>
    %c1_i32 = arith.constant 1 : i32
    %81 = tpu.dynamic_rotate %44 by %c1_i32 dim 2 : vector<2x2x128xf32>, i32 -> vector<2x2x128xf32>
    %c2 = arith.constant 2 : index
    %82 = memref.load %arg4[%c2] : memref<14xf32, #tpu.memory_space<smem>>
    %83 = vector.extract_strided_slice %81 {offsets = [0, 0, 0], sizes = [2, 1, 128], strides = [1, 1, 1]} : vector<2x2x128xf32> to vector<2x1x128xf32>
    %84 = vector.broadcast %82 : f32 to vector<2x1x128xf32>
    %85 = arith.mulf %84, %83 : vector<2x1x128xf32>
    %c9 = arith.constant 9 : index
    %86 = memref.load %arg4[%c9] : memref<14xf32, #tpu.memory_space<smem>>
    %87 = vector.extract_strided_slice %81 {offsets = [0, 1, 0], sizes = [2, 1, 128], strides = [1, 1, 1]} : vector<2x2x128xf32> to vector<2x1x128xf32>
    %88 = vector.broadcast %86 : f32 to vector<2x1x128xf32>
    %89 = arith.mulf %88, %87 : vector<2x1x128xf32>
    %90 = arith.addf %85, %89 : vector<2x1x128xf32>
    %c1_i32_23 = arith.constant 1 : i32
    %91 = vector.broadcast %c1_i32_23 : i32 to vector<1x1x128xi32>
    %92 = arith.cmpi sge, %45, %91 : vector<1x1x128xi32>
    %cst_24 = arith.constant 0.000000e+00 : f32
    %93 = vector.shape_cast %92 : vector<1x1x128xi1> to vector<1x1x128xi1>
    %94 = vector.broadcast %93 : vector<1x1x128xi1> to vector<2x1x128xi1>
    %95 = vector.broadcast %cst_24 : f32 to vector<2x1x128xf32>
    %96 = arith.select %94, %90, %95 : vector<2x1x128xi1>, vector<2x1x128xf32>
    %97 = arith.addf %80, %96 : vector<2x1x128xf32>
    %c3 = arith.constant 3 : index
    %98 = memref.load %arg4[%c3] : memref<14xf32, #tpu.memory_space<smem>>
    %99 = vector.extract_strided_slice %44 {offsets = [0, 0, 0], sizes = [2, 1, 128], strides = [1, 1, 1]} : vector<2x2x128xf32> to vector<2x1x128xf32>
    %100 = vector.broadcast %98 : f32 to vector<2x1x128xf32>
    %101 = arith.mulf %100, %99 : vector<2x1x128xf32>
    %c10 = arith.constant 10 : index
    %102 = memref.load %arg4[%c10] : memref<14xf32, #tpu.memory_space<smem>>
    %103 = vector.extract_strided_slice %44 {offsets = [0, 1, 0], sizes = [2, 1, 128], strides = [1, 1, 1]} : vector<2x2x128xf32> to vector<2x1x128xf32>
    %104 = vector.broadcast %102 : f32 to vector<2x1x128xf32>
    %105 = arith.mulf %104, %103 : vector<2x1x128xf32>
    %106 = arith.addf %101, %105 : vector<2x1x128xf32>
    %107 = arith.addf %97, %106 : vector<2x1x128xf32>
    %c127_i32 = arith.constant 127 : i32
    %108 = tpu.dynamic_rotate %44 by %c127_i32 dim 2 : vector<2x2x128xf32>, i32 -> vector<2x2x128xf32>
    %c4 = arith.constant 4 : index
    %109 = memref.load %arg4[%c4] : memref<14xf32, #tpu.memory_space<smem>>
    %110 = vector.extract_strided_slice %108 {offsets = [0, 0, 0], sizes = [2, 1, 128], strides = [1, 1, 1]} : vector<2x2x128xf32> to vector<2x1x128xf32>
    %111 = vector.broadcast %109 : f32 to vector<2x1x128xf32>
    %112 = arith.mulf %111, %110 : vector<2x1x128xf32>
    %c11 = arith.constant 11 : index
    %113 = memref.load %arg4[%c11] : memref<14xf32, #tpu.memory_space<smem>>
    %114 = vector.extract_strided_slice %108 {offsets = [0, 1, 0], sizes = [2, 1, 128], strides = [1, 1, 1]} : vector<2x2x128xf32> to vector<2x1x128xf32>
    %115 = vector.broadcast %113 : f32 to vector<2x1x128xf32>
    %116 = arith.mulf %115, %114 : vector<2x1x128xf32>
    %117 = arith.addf %112, %116 : vector<2x1x128xf32>
    %c127_i32_25 = arith.constant 127 : i32
    %118 = vector.broadcast %c127_i32_25 : i32 to vector<1x1x128xi32>
    %119 = arith.cmpi slt, %45, %118 : vector<1x1x128xi32>
    %cst_26 = arith.constant 0.000000e+00 : f32
    %120 = vector.shape_cast %119 : vector<1x1x128xi1> to vector<1x1x128xi1>
    %121 = vector.broadcast %120 : vector<1x1x128xi1> to vector<2x1x128xi1>
    %122 = vector.broadcast %cst_26 : f32 to vector<2x1x128xf32>
    %123 = arith.select %121, %117, %122 : vector<2x1x128xi1>, vector<2x1x128xf32>
    %124 = arith.addf %107, %123 : vector<2x1x128xf32>
    %c126_i32 = arith.constant 126 : i32
    %125 = tpu.dynamic_rotate %44 by %c126_i32 dim 2 : vector<2x2x128xf32>, i32 -> vector<2x2x128xf32>
    %c5 = arith.constant 5 : index
    %126 = memref.load %arg4[%c5] : memref<14xf32, #tpu.memory_space<smem>>
    %127 = vector.extract_strided_slice %125 {offsets = [0, 0, 0], sizes = [2, 1, 128], strides = [1, 1, 1]} : vector<2x2x128xf32> to vector<2x1x128xf32>
    %128 = vector.broadcast %126 : f32 to vector<2x1x128xf32>
    %129 = arith.mulf %128, %127 : vector<2x1x128xf32>
    %c12 = arith.constant 12 : index
    %130 = memref.load %arg4[%c12] : memref<14xf32, #tpu.memory_space<smem>>
    %131 = vector.extract_strided_slice %125 {offsets = [0, 1, 0], sizes = [2, 1, 128], strides = [1, 1, 1]} : vector<2x2x128xf32> to vector<2x1x128xf32>
    %132 = vector.broadcast %130 : f32 to vector<2x1x128xf32>
    %133 = arith.mulf %132, %131 : vector<2x1x128xf32>
    %134 = arith.addf %129, %133 : vector<2x1x128xf32>
    %c126_i32_27 = arith.constant 126 : i32
    %135 = vector.broadcast %c126_i32_27 : i32 to vector<1x1x128xi32>
    %136 = arith.cmpi slt, %45, %135 : vector<1x1x128xi32>
    %cst_28 = arith.constant 0.000000e+00 : f32
    %137 = vector.shape_cast %136 : vector<1x1x128xi1> to vector<1x1x128xi1>
    %138 = vector.broadcast %137 : vector<1x1x128xi1> to vector<2x1x128xi1>
    %139 = vector.broadcast %cst_28 : f32 to vector<2x1x128xf32>
    %140 = arith.select %138, %134, %139 : vector<2x1x128xi1>, vector<2x1x128xf32>
    %141 = arith.addf %124, %140 : vector<2x1x128xf32>
    %c125_i32 = arith.constant 125 : i32
    %142 = tpu.dynamic_rotate %44 by %c125_i32 dim 2 : vector<2x2x128xf32>, i32 -> vector<2x2x128xf32>
    %c6 = arith.constant 6 : index
    %143 = memref.load %arg4[%c6] : memref<14xf32, #tpu.memory_space<smem>>
    %144 = vector.extract_strided_slice %142 {offsets = [0, 0, 0], sizes = [2, 1, 128], strides = [1, 1, 1]} : vector<2x2x128xf32> to vector<2x1x128xf32>
    %145 = vector.broadcast %143 : f32 to vector<2x1x128xf32>
    %146 = arith.mulf %145, %144 : vector<2x1x128xf32>
    %c13 = arith.constant 13 : index
    %147 = memref.load %arg4[%c13] : memref<14xf32, #tpu.memory_space<smem>>
    %148 = vector.extract_strided_slice %142 {offsets = [0, 1, 0], sizes = [2, 1, 128], strides = [1, 1, 1]} : vector<2x2x128xf32> to vector<2x1x128xf32>
    %149 = vector.broadcast %147 : f32 to vector<2x1x128xf32>
    %150 = arith.mulf %149, %148 : vector<2x1x128xf32>
    %151 = arith.addf %146, %150 : vector<2x1x128xf32>
    %c125_i32_29 = arith.constant 125 : i32
    %152 = vector.broadcast %c125_i32_29 : i32 to vector<1x1x128xi32>
    %153 = arith.cmpi slt, %45, %152 : vector<1x1x128xi32>
    %cst_30 = arith.constant 0.000000e+00 : f32
    %154 = vector.shape_cast %153 : vector<1x1x128xi1> to vector<1x1x128xi1>
    %155 = vector.broadcast %154 : vector<1x1x128xi1> to vector<2x1x128xi1>
    %156 = vector.broadcast %cst_30 : f32 to vector<2x1x128xf32>
    %157 = arith.select %155, %151, %156 : vector<2x1x128xi1>, vector<2x1x128xf32>
    %158 = arith.addf %141, %157 : vector<2x1x128xf32>
    %159 = arith.negf %158 : vector<2x1x128xf32>
    %160 = math.exp %159 : vector<2x1x128xf32>
    %cst_31 = arith.constant 1.000000e+00 : f32
    %161 = vector.broadcast %cst_31 : f32 to vector<2x1x128xf32>
    %162 = arith.addf %161, %160 : vector<2x1x128xf32>
    %163 = arith.divf %161, %162 : vector<2x1x128xf32>
    %164 = vector.broadcast %163 : vector<2x1x128xf32> to vector<2x32x128xf32>
    %165 = arith.mulf %37, %164 : vector<2x32x128xf32>
    %c0_32 = arith.constant 0 : index
    %c0_33 = arith.constant 0 : index
    %c0_34 = arith.constant 0 : index
    %166 = vector.load %arg5[%c0_32, %c0_33, %c0_34] : memref<2x32x128xf32, #tpu.memory_space<vmem>>, vector<2x32x128xf32>
    tpu.vector_store %arg5[%c0_32, %c0_33, %c0_34], %165 {strides = array<i32>} : memref<2x32x128xf32, #tpu.memory_space<vmem>>, vector<2x32x128xf32>,
    return
  }
  func.func @transform_0(%arg0: i32) -> (i32, i32, i32) {
    %c0_i32 = arith.constant 0 : i32
    %c0_i32_0 = arith.constant 0 : i32
    %c0_i32_1 = arith.constant 0 : i32
    %c0_i32_2 = arith.constant 0 : i32
    return %c0_i32, %c0_i32_0, %c0_i32_1 : i32, i32, i32
  }
  func.func @transform_1(%arg0: i32) -> (i32, i32) {
    %c0_i32 = arith.constant 0 : i32
    %c0_i32_0 = arith.constant 0 : i32
    %c0_i32_1 = arith.constant 0 : i32
    return %c0_i32, %c0_i32_0 : i32, i32
  }
  func.func @transform_2(%arg0: i32) -> (i32, i32) {
    %c0_i32 = arith.constant 0 : i32
    %c0_i32_0 = arith.constant 0 : i32
    %c0_i32_1 = arith.constant 0 : i32
    return %c0_i32, %c0_i32_0 : i32, i32
  }
  func.func @transform_3(%arg0: i32) -> i32 {
    %c0_i32 = arith.constant 0 : i32
    %c0_i32_0 = arith.constant 0 : i32
    return %c0_i32 : i32
  }
  func.func @transform_4(%arg0: i32) -> (i32, i32, i32) {
    %c0_i32 = arith.constant 0 : i32
    %c0_i32_0 = arith.constant 0 : i32
    %c0_i32_1 = arith.constant 0 : i32
    %c0_i32_2 = arith.constant 0 : i32
    return %c0_i32, %c0_i32_0, %c0_i32_1 : i32, i32, i32
  }
}

</mosaic_0001>

<bundles_post_ra>
// kernel: cbam1d_pallas.1
= control target key start
LH: loop header
LB: loop body
LE: loop exit
PB: predicated region body
PF: predicated region fallthrough
CT: control target
= control target key end

     0   :  { %9 = vsyncpa [#allocation3], 0  ;;  %s2632_s0 = inlined_call_operand.hbm [shape: f32[2,32,128], index: 0, kind: input, shape index: {}]   ;;  %s2633_s1 = inlined_call_operand.vmem [shape: f32[2,32], index: 1, kind: input, shape index: {}]   ;;  %s2634_s2 = inlined_call_operand.vmem [shape: f32[32,2], index: 2, kind: input, shape index: {}]   ;;  %s2635_s3 = inlined_call_operand.vmem [shape: f32[14], index: 3, kind: input, shape index: {}]   ;;  %s2636_s4 = inlined_call_operand.hbm [shape: f32[2,32,128], index: 4, kind: output, shape index: {}]  }
   0x1   :  { %10 = vsyncpa [#allocation5], 0 }
   0x2   :  { %11 = vsyncpa [#allocation4], 0  ;;  %s1902_s15 = smov [#allocation2]   ;;  %s34_s19 = sshll.u32 %s2635_s3, 4  ;;  %s35_s19 = int_to_ptr.vmem [resolvable:$true] %s34_s19 }
   0x3   :  { %s17_s16 = sshll.u32 %s1902_s15, 4  ;;  %s1840_s22 = scalar_lea.hbm %s2632_s0, 1024  ;;  %s18_s16 = int_to_ptr.vmem [resolvable:$true] %s17_s16 }
   0x4   :  { %p1841_p0 = scmp.ne.s32.totalorder %s2632_s0, %s1840_s22  ;;  %p1844_p1 = scmp.lt.u32.totalorder %s1840_s22, %s2632_s0 }
   0x6   :  { %p1846_p2 = pnand %p1844_p1, %p1841_p0 }
   0x8   :  { %1849 = shalt.err (!%p1846_p2)
}
   0x9   :  { %s1850_s27 = scalar_lea.vmem %s18_s16, 1024  ;;  %p1855_p4 = scmp.lt.s32.totalorder %s18_s16, %s18_s16 }
   0xa   :  { %p1851_p3 = scmp.ne.s32.totalorder %s18_s16, %s1850_s27  ;;  %p1856_p5 = scmp.lt.s32.totalorder %s1850_s27, %s1850_s27 }
   0xc   :  { %p1857_p6 = por %p1856_p5, %p1855_p4 }
   0xe   :  { %p1858_p7 = pnand %p1857_p6, %p1851_p3 }
  0x10   :  { %1861 = shalt.err (!%p1858_p7)
}
  0x11   :  { %s1903_s3 = smov 128   ;;  %s1904_s28 = smov 8  }
  0x12   :  { %23 = dma.hbm_to_vmem [thread:$0]  %s2632_s0, 1024, %s18_s16, [#allocation3], %s1903_s3, %s1903_s3, %s1904_s28  }
  0x13   :  { %s1862_s5 = scalar_lea.vmem %s35_s19, 16  ;;  %p1867_p9 = scmp.lt.s32.totalorder %s35_s19, %s35_s19 }
  0x14   :  { %p1863_p8 = scmp.ne.s32.totalorder %s35_s19, %s1862_s5  ;;  %p1868_p10 = scmp.lt.s32.totalorder %s1862_s5, %s1862_s5 }
  0x16   :  { %p1869_p11 = por %p1868_p10, %p1867_p9 }
  0x18   :  { %p1870_p12 = pnand %p1869_p11, %p1863_p8 }
  0x1a   :  { %1873 = shalt.err (!%p1870_p12)
}
  0x1b   :  { %s1905_s6 = smov [#allocation6]  }
  0x1c   :  { %37 = dma.vmem_to_smem %s35_s19, 16, %s1905_s6, [#allocation5]  }
  0x1d   :  { %1896 = dma.done.wait [#allocation3], 1024  }
  0x1e   :  { %1897 = vsyncadd [#allocation3], 4294966272 }
  0x1f   :  { %1898 = dma.done.wait [#allocation5], 16  }
  0x20   :  { %1899 = vsyncadd [#allocation5], 4294967280 }
  0x21   :  { %44 = sfence }
  0x22   :  { %v47_v0 = vld [vmem:[#allocation2 + $0x10] sm:$0xff]  ;;  %v45_v1 = vld [vmem:[#allocation2] sm:$0xff]  ;;  %v48_v2 = vld [vmem:[#allocation2 + $0x18] sm:$0xff]  ;;  %v99_v8 = vlaneseq  ;;  %v1906_v14 = vmov 0   ;;  %vm236_vm0 = vcmask 130112   ;;  %vm243_vm1 = vcmask 195712  }
  0x23   :  { %57 = vadd.xlane.f32.xlu1 %v47_v0  ;;  %53 = vadd.xlane.f32.xlu0 %v45_v1  ;;  %v46_v3 = vld [vmem:[#allocation2 + $0x8] sm:$0xff]  ;;  %v49_v5 = vld [vmem:[#allocation2 + $0x20] sm:$0xff]  ;;  %v52_v6 = vld [vmem:[#allocation2 + $0x38] sm:$0xff]  ;;  %vm250_vm2 = vcmask 261312   ;;  %vm309_vm3 = vcmask 1041409   ;;  %vm314_vm4 = vcmask 254976  }
  0x24   :  { %v50_v4 = vld [vmem:[#allocation2 + $0x28] sm:$0xff]  ;;  %v51_v7 = vld [vmem:[#allocation2 + $0x30] sm:$0xff]  ;;  %v1958_v9 = vshrl.u32 %v99_v8, 7  ;;  %v93_v11 = vld [vmem:[%s2633_s1] sm:$0x3]  ;;  %1791 = vset.pattern.permute.xlu1 %v1906_v14  ;;  %1790 = vset.pattern.permute.xlu0 %v1906_v14  ;;  %vm1330_vm5 = vcmask 1042434  }
  0x25   :  { %vm1332_vm6 = vcmask 1043459   ;;  %vm1334_vm7 = vcmask 1044484   ;;  %vm1336_vm8 = vcmask 1045509   ;;  %vm1338_vm9 = vcmask 1046534   ;;  %s1908_s15 = smov 1   ;;  %s1909_s16 = smov 2  }
  0x26   :  { %v1961_v10 = vsub.s32 0, %v1958_v9  ;;  %v1968_v13 = vsub.s32 1, %v1958_v9  ;;  %vm1340_vm10 = vcmask 1047559   ;;  %vm1399_vm11 = vcmask 15360   ;;  %s1910_s17 = smov 127   ;;  %s1911_s18 = smov 126  }
  0x27   :  { %59 = vadd.xlane.f32.xlu1 %v48_v2  ;;  %55 = vadd.xlane.f32.xlu0 %v46_v3  ;;  %vm1518_vm12 = vcmask 1040384   ;;  %s1912_s19 = smov 125   ;;  %s1763_s20 = sld [smem:[#allocation6 + $0x7]] }
  0x28   :  { %v102_v12 = vrot.slane %v93_v11, %v1961_v10  ;;  %v121_v15 = vrot.slane %v93_v11, %v1968_v13  ;;  %s1769_s21 = sld [smem:[#allocation6 + $0xa]]  ;;  %s2532_s22 = sld [smem:[#allocation6 + $0x8]] }
  0x29   :  { %s2534_s23 = sld [smem:[#allocation6 + $0x9]]  ;;  %s2536_s24 = sld [smem:[#allocation6 + $0x3]] }
  0x2a   :  { %s2538_s25 = sld [smem:[#allocation6]]  ;;  %s2540_s26 = sld [smem:[#allocation6 + $0x1]] }
  0x2b   :  { %63 = vadd.xlane.f32.xlu1 %v50_v4  ;;  %61 = vadd.xlane.f32.xlu0 %v49_v5  ;;  %s2542_s27 = sld [smem:[#allocation6 + $0x2]]  ;;  %s2544_s29 = sld [smem:[#allocation6 + $0xb]] }
  0x2c   :  { %s2546_s30 = sld [smem:[#allocation6 + $0x4]]  ;;  %s2555_s6 = sld [smem:[#allocation6 + $0x5]] }
  0x2d   :  { %s2548_s5 = sld [smem:[#allocation6 + $0xc]]  ;;  %s2560_s0 = sld [smem:[#allocation6 + $0xd]] }
  0x2e   :  { %s2566_s7 = sld [smem:[#allocation6 + $0x6]]  ;;  %s1913_s1 = smov [#allocation7]  }
  0x2f   :  { %67 = vadd.xlane.f32.xlu1 %v52_v6  ;;  %65 = vadd.xlane.f32.xlu0 %v51_v7  ;;  %s1742_s8 = sshll.u32 %s1913_s1, 4  ;;  %s1743_s8 = int_to_ptr.vmem [resolvable:$true] %s1742_s8 }
  0x30   :  { %s1874_s9 = scalar_lea.vmem %s1743_s8, 1024  ;;  %p1879_p0 = scmp.lt.s32.totalorder %s1743_s8, %s1743_s8 }
  0x31   :  { %p1875_p13 = scmp.ne.s32.totalorder %s1743_s8, %s1874_s9  ;;  %p1880_p1 = scmp.lt.s32.totalorder %s1874_s9, %s1874_s9 }
  0x33   :  { %79 = vmax.xlane.f32.xlu1 %v46_v3  ;;  %77 = vmax.xlane.f32.xlu0 %v45_v1  ;;  %p1881_p2 = por %p1880_p1, %p1879_p0 }
  0x35   :  { %p1882_p3 = pnand %p1881_p2, %p1875_p13 }
  0x37   :  { %83 = vmax.xlane.f32.xlu1 %v48_v2  ;;  %81 = vmax.xlane.f32.xlu0 %v47_v0 }
  0x3b   :  { %87 = vmax.xlane.f32.xlu1 %v50_v4  ;;  %85 = vmax.xlane.f32.xlu0 %v49_v5 }
  0x3f   :  { %91 = vmax.xlane.f32.xlu1 %v52_v6  ;;  %89 = vmax.xlane.f32.xlu0 %v51_v7 }
  0x50   :  { %108 = vbcast.lane.b32.xlu1 %v102_v12, 264 }
  0x54   :  { %112 = vbcast.lane.b32.xlu1 %v102_v12, 272 }
  0x55   :  { %104 = vbcast.lane.b32.xlu0 %v102_v12, 256 }
  0x58   :  { %116 = vbcast.lane.b32.xlu1 %v102_v12, 280 }
  0x59   :  { %123 = vbcast.lane.b32.xlu0 %v121_v15, 256 }
  0x5c   :  { %127 = vbcast.lane.b32.xlu1 %v121_v15, 264 }
  0x5d   :  { %131 = vbcast.lane.b32.xlu0 %v121_v15, 272 }
  0x60   :  { %135 = vbcast.lane.b32.xlu1 %v121_v15, 280 }
  0xb0   :  { %v58_v16 = vpop.xlane.xlu1 %57  ;;  %v54_v17 = vpop.xlane.xlu0 %53 }
  0xb1   :  { %v71_v58 = vmul.f32 0.0078125, %v58_v16  ;;  %v69_v59 = vmul.f32 0.0078125, %v54_v17  ;;  %v94_v17 = vld [vmem:[%s2634_s2] sm:$0xff] }
  0xb4   :  { %v60_v18 = vpop.xlane.xlu1 %59  ;;  %v56_v19 = vpop.xlane.xlu0 %55 }
  0xb5   :  { %v70_v55 = vmul.f32 0.0078125, %v56_v19  ;;  %v72_v62 = vmul.f32 0.0078125, %v60_v18 }
  0xb8   :  { %v1971_v20 = vpop.xlane.xlu1 %63  ;;  %v1973_v21 = vpop.xlane.xlu0 %61 }
  0xb9   :  { %v73_v3 = vmul.f32 0.0078125, %v1973_v21  ;;  %v74_v6 = vmul.f32 0.0078125, %v1971_v20  ;;  %v507_v20 = vrot.slane %v94_v17, %v1968_v13  ;;  %v513_v21 = vsub.s32 2, %v1958_v9 }
  0xbc   :  { %v1975_v22 = vpop.xlane.xlu1 %67  ;;  %v1977_v23 = vpop.xlane.xlu0 %65 }
  0xbd   :  { %v75_v7 = vmul.f32 0.0078125, %v1977_v23  ;;  %v76_v14 = vmul.f32 0.0078125, %v1975_v22  ;;  %v514_v23 = vrot.slane %v94_v17, %v513_v21 }
  0xc0   :  { %v80_v24 = vpop.xlane.xlu1 %79  ;;  %v78_v25 = vpop.xlane.xlu0 %77 }
  0xc4   :  { %v84_v26 = vpop.xlane.xlu1 %83  ;;  %v82_v27 = vpop.xlane.xlu0 %81 }
  0xc8   :  { %v88_v28 = vpop.xlane.xlu1 %87  ;;  %v86_v29 = vpop.xlane.xlu0 %85 }
  0xcc   :  { %v92_v30 = vpop.xlane.xlu1 %91  ;;  %v90_v31 = vpop.xlane.xlu0 %89 }
  0xd0   :  { %v1979_v32 = vpop.permute.xlu1 %108  ;;  %v105_v33 = vpop.permute.xlu0 %104 }
  0xd1   :  { %v322_v34 = vmul.f32 %v1979_v32, %v80_v24  ;;  %v321_v35 = vmul.f32 %v105_v33, %v78_v25  ;;  %v329_v44 = vmul.f32 %v105_v33, %v86_v29  ;;  %v330_v45 = vmul.f32 %v1979_v32, %v88_v28 }
  0xd2   :  { %v146_v57 = vmul.f32 %v1979_v32, %v70_v55  ;;  %v145_v60 = vmul.f32 %v105_v33, %v69_v59  ;;  %v153_v5 = vmul.f32 %v105_v33, %v73_v3  ;;  %v154_v11 = vmul.f32 %v1979_v32, %v74_v6 }
  0xd3   :  { %357 = vperm.xlu1 %1791, %v322_v34   ;;  %354 = vperm.xlu0 %1790, %v321_v35   ;;  %v2012_v33 = vsub.s32 7, %v1958_v9  ;;  %v95_v34 = vld [vmem:[%s2634_s2 + $0x8] sm:$0xff] }
  0xd4   :  { %v113_v36 = vpop.permute.xlu1 %112  ;;  %v1982_v38 = vpop.permute.xlu0 %123  ;;  %v556_v35 = vrot.slane %v95_v34, %v1961_v10 }
  0xd5   :  { %v323_v37 = vmul.f32 %v113_v36, %v82_v27  ;;  %v325_v41 = vmul.f32 %v1982_v38, %v78_v25  ;;  %v333_v46 = vmul.f32 %v1982_v38, %v86_v29  ;;  %v331_v50 = vmul.f32 %v113_v36, %v90_v31 }
  0xd6   :  { %v147_v61 = vmul.f32 %v113_v36, %v71_v58  ;;  %v149_v0 = vmul.f32 %v1982_v38, %v69_v59  ;;  %v155_v12 = vmul.f32 %v113_v36, %v75_v7  ;;  %v157_v16 = vmul.f32 %v1982_v38, %v73_v3 }
  0xd7   :  { %360 = vperm.xlu1 %1791, %v323_v37   ;;  %v500_v25 = vrot.slane %v94_v17, %v1961_v10  ;;  %v549_v36 = vrot.slane %v94_v17, %v2012_v33  ;;  %v570_v37 = vrot.slane %v95_v34, %v513_v21  ;;  %v563_v38 = vrot.slane %v95_v34, %v1968_v13 }
  0xd8   :  { %v117_v39 = vpop.permute.xlu1 %116  ;;  %v132_v47 = vpop.permute.xlu0 %131 }
  0xd9   :  { %v324_v40 = vmul.f32 %v117_v39, %v84_v26  ;;  %v327_v49 = vmul.f32 %v132_v47, %v82_v27  ;;  %v335_v51 = vmul.f32 %v132_v47, %v90_v31  ;;  %v332_v54 = vmul.f32 %v117_v39, %v92_v30 }
  0xda   :  { %v148_v63 = vmul.f32 %v117_v39, %v72_v62  ;;  %v151_v2 = vmul.f32 %v132_v47, %v71_v58  ;;  %v156_v15 = vmul.f32 %v117_v39, %v76_v14  ;;  %v159_v19 = vmul.f32 %v132_v47, %v75_v7  ;;  %v2023_v39 = vld [vmem:[%s2634_s2 + $0x10] sm:$0xff] }
  0xdb   :  { %363 = vperm.xlu0 %1790, %v324_v40   ;;  %366 = vperm.xlu1 %1791, %v325_v41   ;;  %v612_v40 = vrot.slane %v2023_v39, %v1961_v10 }
  0xdc   :  { %v128_v42 = vpop.permute.xlu1 %127 }
  0xdd   :  { %v326_v43 = vmul.f32 %v128_v42, %v80_v24  ;;  %v334_v48 = vmul.f32 %v128_v42, %v88_v28  ;;  %v150_v1 = vmul.f32 %v128_v42, %v70_v55  ;;  %v158_v18 = vmul.f32 %v128_v42, %v74_v6 }
  0xde   :  { %v527_v24 = vsub.s32 4, %v1958_v9  ;;  %v2004_v28 = vsub.s32 6, %v1958_v9 }
  0xdf   :  { %369 = vperm.xlu0 %1790, %v326_v43   ;;  %378 = vperm.xlu1 %1791, %v329_v44   ;;  %v619_v43 = vrot.slane %v2023_v39, %v1968_v13 }
  0xe0   :  { %v136_v52 = vpop.permute.xlu1 %135  ;;  %v528_v27 = vrot.slane %v94_v17, %v527_v24  ;;  %v542_v31 = vrot.slane %v94_v17, %v2004_v28  ;;  %v584_v42 = vrot.slane %v95_v34, %v527_v24  ;;  %v654_v55 = vrot.slane %v2023_v39, %v2004_v28 }
  0xe1   :  { %v328_v53 = vmul.f32 %v136_v52, %v84_v26  ;;  %v336_v56 = vmul.f32 %v136_v52, %v92_v30  ;;  %v152_v4 = vmul.f32 %v136_v52, %v72_v62  ;;  %v160_v22 = vmul.f32 %v136_v52, %v76_v14 }
  0xe2   :  { %v520_v26 = vsub.s32 3, %v1958_v9  ;;  %v2007_v30 = vsub.s32 5, %v1958_v9  ;;  %v640_v52 = vrot.slane %v2023_v39, %v527_v24  ;;  %v2052_v62 = vand.u32 127, %v99_v8 }
  0xe3   :  { %381 = vperm.xlu0 %1790, %v330_v45   ;;  %390 = vperm.xlu1 %1791, %v333_v46   ;;  %v626_v45 = vrot.slane %v2023_v39, %v513_v21  ;;  %v2034_v46 = vld [vmem:[%s2634_s2 + $0x18] sm:$0xff]  ;;  %s1907_s2 = smov 3  }
  0xe4   :  { %v521_v29 = vrot.slane %v94_v17, %v520_v26  ;;  %v535_v32 = vrot.slane %v94_v17, %v2007_v30  ;;  %v577_v41 = vrot.slane %v95_v34, %v520_v26  ;;  %v591_v44 = vrot.slane %v95_v34, %v2007_v30 }
  0xe5   :  { %v668_v47 = vrot.slane %v2034_v46, %v1961_v10  ;;  %v2059_v6 = vsub.s32 %v2052_v62, %v1958_v9  ;;  %vm1541_vm13 = vcmp.ge.s32.totalorder %v2052_v62, 3  ;;  %vm1568_vm14 = vcmp.ge.s32.totalorder %v2052_v62, 2 }
  0xe6   :  { %vm1595_vm15 = vcmp.ge.s32.totalorder %v2052_v62, 1 }
  0xe7   :  { %393 = vperm.xlu0 %1790, %v334_v48   ;;  %372 = vperm.xlu1 %1791, %v327_v49   ;;  %v633_v48 = vrot.slane %v2023_v39, %v520_v26  ;;  %v598_v49 = vrot.slane %v95_v34, %v2004_v28 }
  0xeb   :  { %384 = vperm.xlu0 %1790, %v331_v50   ;;  %396 = vperm.xlu1 %1791, %v335_v51   ;;  %v675_v50 = vrot.slane %v2034_v46, %v1968_v13  ;;  %v682_v51 = vrot.slane %v2034_v46, %v513_v21  ;;  %v689_v13 = vrot.slane %v2034_v46, %v520_v26 }
  0xef   :  { %375 = vperm.xlu0 %1790, %v328_v53   ;;  %387 = vperm.xlu1 %1791, %v332_v54   ;;  %v647_v53 = vrot.slane %v2023_v39, %v2007_v30  ;;  %v605_v54 = vrot.slane %v95_v34, %v2012_v33 }
  0xf3   :  { %399 = vperm.xlu0 %1790, %v336_v56   ;;  %181 = vperm.xlu1 %1791, %v146_v57   ;;  %v696_v56 = vrot.slane %v2034_v46, %v527_v24 }
  0xf7   :  { %178 = vperm.xlu0 %1790, %v145_v60   ;;  %184 = vperm.xlu1 %1791, %v147_v61  }
  0xfb   :  { %187 = vperm.xlu0 %1790, %v148_v63   ;;  %190 = vperm.xlu1 %1791, %v149_v0  }
  0xff   :  { %193 = vperm.xlu0 %1790, %v150_v1   ;;  %196 = vperm.xlu1 %1791, %v151_v2   ;;  %v231_v1 = vadd.s32 4294967288, %v2052_v62  ;;  %v238_v2 = vadd.s32 4294967280, %v2052_v62 }
 0x101   :  { %v2062_v7 = vsub.s32 %v231_v1, %v1958_v9  ;;  %v2065_v8 = vsub.s32 %v238_v2, %v1958_v9 }
 0x103   :  { %199 = vperm.xlu0 %1790, %v152_v4   ;;  %202 = vperm.xlu1 %1791, %v153_v5   ;;  %v245_v5 = vadd.s32 4294967272, %v2052_v62 }
 0x105   :  { %v2068_v14 = vsub.s32 %v245_v5, %v1958_v9 }
 0x107   :  { %205 = vperm.xlu0 %1790, %v154_v11   ;;  %208 = vperm.xlu1 %1791, %v155_v12  }
 0x10b   :  { %211 = vperm.xlu0 %1790, %v156_v15   ;;  %214 = vperm.xlu1 %1791, %v157_v16  }
 0x10f   :  { %217 = vperm.xlu0 %1790, %v158_v18   ;;  %220 = vperm.xlu1 %1791, %v159_v19  }
 0x113   :  { %223 = vperm.xlu0 %1790, %v160_v22   ;;  %509 = vbcast.lane.b32.xlu1 %v507_v20, 256 }
 0x117   :  { %516 = vbcast.lane.b32.xlu1 %v514_v23, 256  ;;  %502 = vbcast.lane.b32.xlu0 %v500_v25, 256 }
 0x11b   :  { %530 = vbcast.lane.b32.xlu1 %v528_v27, 256  ;;  %523 = vbcast.lane.b32.xlu0 %v521_v29, 256 }
 0x11f   :  { %544 = vbcast.lane.b32.xlu1 %v542_v31, 256  ;;  %537 = vbcast.lane.b32.xlu0 %v535_v32, 256 }
 0x123   :  { %558 = vbcast.lane.b32.xlu1 %v556_v35, 256  ;;  %551 = vbcast.lane.b32.xlu0 %v549_v36, 256 }
 0x127   :  { %572 = vbcast.lane.b32.xlu1 %v570_v37, 256  ;;  %565 = vbcast.lane.b32.xlu0 %v563_v38, 256 }
 0x12b   :  { %614 = vbcast.lane.b32.xlu1 %v612_v40, 256  ;;  %579 = vbcast.lane.b32.xlu0 %v577_v41, 256 }
 0x12f   :  { %586 = vbcast.lane.b32.xlu1 %v584_v42, 256  ;;  %621 = vbcast.lane.b32.xlu0 %v619_v43, 256 }
 0x133   :  { %593 = vbcast.lane.b32.xlu1 %v591_v44, 256  ;;  %628 = vbcast.lane.b32.xlu0 %v626_v45, 256 }
 0x137   :  { %670 = vbcast.lane.b32.xlu1 %v668_v47, 256  ;;  %635 = vbcast.lane.b32.xlu0 %v633_v48, 256 }
 0x13b   :  { %600 = vbcast.lane.b32.xlu1 %v598_v49, 256  ;;  %677 = vbcast.lane.b32.xlu0 %v675_v50, 256 }
 0x13f   :  { %684 = vbcast.lane.b32.xlu1 %v682_v51, 256  ;;  %642 = vbcast.lane.b32.xlu0 %v640_v52, 256 }
 0x143   :  { %649 = vbcast.lane.b32.xlu1 %v647_v53, 256  ;;  %607 = vbcast.lane.b32.xlu0 %v605_v54, 256 }
 0x147   :  { %656 = vbcast.lane.b32.xlu1 %v654_v55, 256  ;;  %691 = vbcast.lane.b32.xlu0 %v689_v13, 256 }
 0x14b   :  { %698 = vbcast.lane.b32.xlu0 %v696_v56, 256 }
 0x152   :  { %v358_v57 = vpop.permute.xlu1 %357  ;;  %v355_v58 = vpop.permute.xlu0 %354 }
 0x153   :  { %v408_v15 = vrot.slane %v358_v57, %v2062_v7  ;;  %v404_v16 = vrot.slane %v355_v58, %v2059_v6 }
 0x155   :  { %v409_v23 = vsel %vm236_vm0, %v408_v15, %v404_v16 }
 0x156   :  { %v361_v59 = vpop.permute.xlu1 %360 }
 0x157   :  { %v413_v17 = vrot.slane %v361_v59, %v2065_v8 }
 0x159   :  { %v414_v26 = vsel %vm243_vm1, %v413_v17, %v409_v23 }
 0x15a   :  { %v367_v60 = vpop.permute.xlu1 %366  ;;  %v364_v61 = vpop.permute.xlu0 %363 }
 0x15b   :  { %v418_v21 = vrot.slane %v364_v61, %v2068_v14  ;;  %v423_v9 = vrot.slane %v367_v60, %v2059_v6 }
 0x15d   :  { %v419_v36 = vsel %vm250_vm2, %v418_v21, %v414_v26 }
 0x15e   :  { %v379_v63 = vpop.permute.xlu1 %378  ;;  %v370_v0 = vpop.permute.xlu0 %369 }
 0x15f   :  { %v427_v20 = vrot.slane %v370_v0, %v2062_v7  ;;  %v442_v38 = vrot.slane %v379_v63, %v2059_v6 }
 0x161   :  { %v428_v27 = vsel %vm236_vm0, %v427_v20, %v423_v9 }
 0x162   :  { %v391_v3 = vpop.permute.xlu1 %390  ;;  %v382_v4 = vpop.permute.xlu0 %381 }
 0x163   :  { %v446_v29 = vrot.slane %v382_v4, %v2062_v7  ;;  %v461_v40 = vrot.slane %v391_v3, %v2059_v6 }
 0x165   :  { %v447_v47 = vsel %vm236_vm0, %v446_v29, %v442_v38 }
 0x166   :  { %v373_v11 = vpop.permute.xlu1 %372  ;;  %v394_v12 = vpop.permute.xlu0 %393 }
 0x167   :  { %v432_v22 = vrot.slane %v373_v11, %v2065_v8  ;;  %v465_v31 = vrot.slane %v394_v12, %v2062_v7 }
 0x169   :  { %v433_v37 = vsel %vm243_vm1, %v432_v22, %v428_v27  ;;  %v466_v48 = vsel %vm236_vm0, %v465_v31, %v461_v40 }
 0x16a   :  { %v397_v18 = vpop.permute.xlu1 %396  ;;  %v385_v19 = vpop.permute.xlu0 %384 }
 0x16b   :  { %v470_v34 = vrot.slane %v397_v18, %v2065_v8  ;;  %v451_v35 = vrot.slane %v385_v19, %v2065_v8 }
 0x16d   :  { %v452_v51 = vsel %vm243_vm1, %v451_v35, %v447_v47  ;;  %v471_v52 = vsel %vm243_vm1, %v470_v34, %v466_v48 }
 0x16e   :  { %v388_v24 = vpop.permute.xlu1 %387  ;;  %v376_v25 = vpop.permute.xlu0 %375 }
 0x16f   :  { %v437_v32 = vrot.slane %v376_v25, %v2068_v14  ;;  %v456_v41 = vrot.slane %v388_v24, %v2068_v14 }
 0x171   :  { %v438_v42 = vsel %vm250_vm2, %v437_v32, %v433_v37  ;;  %v457_v53 = vsel %vm250_vm2, %v456_v41, %v452_v51  ;;  %v717_v51 = vrot.slane %v2034_v46, %v2012_v33 }
 0x172   :  { %v182_v43 = vpop.permute.xlu1 %181  ;;  %v400_v44 = vpop.permute.xlu0 %399  ;;  %v477_v45 = vsel %vm309_vm3, %v438_v42, %v419_v36 }
 0x173   :  { %v475_v49 = vrot.slane %v400_v44, %v2068_v14  ;;  %v481_v50 = vsel %vm314_vm4, %v477_v45, 0.0  ;;  %v235_v0 = vrot.slane %v182_v43, %v2062_v7 }
 0x174   :  { %482 = vadd.xlane.f32.xlu1 %v481_v50  ;;  %v703_v50 = vrot.slane %v2034_v46, %v2007_v30 }
 0x175   :  { %v476_v54 = vsel %vm250_vm2, %v475_v49, %v471_v52 }
 0x176   :  { %v185_v55 = vpop.permute.xlu1 %184  ;;  %v179_v13 = vpop.permute.xlu0 %178  ;;  %v478_v56 = vsel %vm309_vm3, %v476_v54, %v457_v53 }
 0x177   :  { %v484_v57 = vsel %vm314_vm4, %v478_v56, 0.0  ;;  %v230_v60 = vrot.slane %v179_v13, %v2059_v6  ;;  %v242_v3 = vrot.slane %v185_v55, %v2065_v8 }
 0x178   :  { %485 = vadd.xlane.f32.xlu0 %v484_v57 }
 0x179   :  { %v237_v5 = vsel %vm236_vm0, %v235_v0, %v230_v60 }
 0x17a   :  { %v191_v58 = vpop.permute.xlu1 %190  ;;  %v188_v59 = vpop.permute.xlu0 %187  ;;  %v244_v18 = vsel %vm243_vm1, %v242_v3, %v237_v5 }
 0x17b   :  { %v255_v1 = vrot.slane %v191_v58, %v2059_v6  ;;  %v249_v11 = vrot.slane %v188_v59, %v2068_v14 }
 0x17d   :  { %v251_v20 = vsel %vm250_vm2, %v249_v11, %v244_v18 }
 0x17e   :  { %v197_v61 = vpop.permute.xlu1 %196  ;;  %v194_v63 = vpop.permute.xlu0 %193 }
 0x17f   :  { %v259_v2 = vrot.slane %v194_v63, %v2062_v7  ;;  %v264_v4 = vrot.slane %v197_v61, %v2065_v8 }
 0x181   :  { %v260_v12 = vsel %vm236_vm0, %v259_v2, %v255_v1 }
 0x182   :  { %v203_v15 = vpop.permute.xlu1 %202  ;;  %v200_v16 = vpop.permute.xlu0 %199  ;;  %v265_v19 = vsel %vm243_vm1, %v264_v4, %v260_v12 }
 0x183   :  { %v269_v17 = vrot.slane %v200_v16, %v2068_v14  ;;  %v274_v32 = vrot.slane %v203_v15, %v2059_v6 }
 0x185   :  { %v270_v21 = vsel %vm250_vm2, %v269_v17, %v265_v19 }
 0x186   :  { %v209_v22 = vpop.permute.xlu1 %208  ;;  %v206_v23 = vpop.permute.xlu0 %205  ;;  %v310_v9 = vsel %vm309_vm3, %v270_v21, %v251_v20 }
 0x187   :  { %v315_v24 = vsel %vm314_vm4, %v310_v9, 0.0  ;;  %v278_v27 = vrot.slane %v206_v23, %v2062_v7  ;;  %v283_v36 = vrot.slane %v209_v22, %v2065_v8 }
 0x188   :  { %316 = vadd.xlane.f32.xlu1 %v315_v24 }
 0x189   :  { %v279_v38 = vsel %vm236_vm0, %v278_v27, %v274_v32 }
 0x18a   :  { %v215_v25 = vpop.permute.xlu1 %214  ;;  %v212_v26 = vpop.permute.xlu0 %211  ;;  %v284_v44 = vsel %vm243_vm1, %v283_v36, %v279_v38 }
 0x18b   :  { %v293_v34 = vrot.slane %v215_v25, %v2059_v6  ;;  %v288_v40 = vrot.slane %v212_v26, %v2068_v14 }
 0x18d   :  { %v289_v47 = vsel %vm250_vm2, %v288_v40, %v284_v44 }
 0x18e   :  { %v221_v29 = vpop.permute.xlu1 %220  ;;  %v218_v31 = vpop.permute.xlu0 %217 }
 0x18f   :  { %v297_v35 = vrot.slane %v218_v31, %v2062_v7  ;;  %v302_v37 = vrot.slane %v221_v29, %v2065_v8  ;;  %v661_v8 = vrot.slane %v2023_v39, %v2012_v33 }
 0x191   :  { %v298_v41 = vsel %vm236_vm0, %v297_v35, %v293_v34  ;;  %vm1640_vm0 = vcmp.lt.s32.totalorder %v2052_v62, 127 }
 0x192   :  { %v224_v42 = vpop.permute.xlu0 %223  ;;  %v303_v45 = vsel %vm243_vm1, %v302_v37, %v298_v41  ;;  %v510_v52 = vpop.permute.xlu1 %509  ;;  %vm1667_vm1 = vcmp.lt.s32.totalorder %v2052_v62, 126 }
 0x193   :  { %v307_v43 = vrot.slane %v224_v42, %v2068_v14  ;;  %v710_v14 = vrot.slane %v2034_v46, %v2004_v28 }
 0x195   :  { %v308_v7 = vsel %vm250_vm2, %v307_v43, %v303_v45  ;;  %vm1694_vm2 = vcmp.lt.s32.totalorder %v2052_v62, 125 }
 0x196   :  { %v311_v48 = vsel %vm309_vm3, %v308_v7, %v289_v47  ;;  %v517_v39 = vpop.permute.xlu1 %516  ;;  %v503_v54 = vpop.permute.xlu0 %502 }
 0x197   :  { %v318_v49 = vsel %vm314_vm4, %v311_v48, 0.0 }
 0x198   :  { %319 = vadd.xlane.f32.xlu0 %v318_v49 }
 0x199   :  { %663 = vbcast.lane.b32.xlu1 %v661_v8, 256 }
 0x19a   :  { %v2142_v53 = vpop.permute.xlu1 %530  ;;  %v2146_v13 = vpop.permute.xlu0 %523 }
 0x19d   :  { %712 = vbcast.lane.b32.xlu1 %v710_v14, 256 }
 0x19e   :  { %v2144_v55 = vpop.permute.xlu1 %544  ;;  %v2148_v28 = vpop.permute.xlu0 %537 }
 0x1a2   :  { %v559_v56 = vpop.permute.xlu1 %558  ;;  %v2150_v58 = vpop.permute.xlu0 %551 }
 0x1a6   :  { %v573_v57 = vpop.permute.xlu1 %572  ;;  %v566_v59 = vpop.permute.xlu0 %565 }
 0x1aa   :  { %v2152_v30 = vpop.permute.xlu1 %614  ;;  %v580_v46 = vpop.permute.xlu0 %579 }
 0x1ae   :  { %705 = vbcast.lane.b32.xlu0 %v703_v50, 256  ;;  %v2154_v33 = vpop.permute.xlu1 %586  ;;  %v2158_v61 = vpop.permute.xlu0 %621 }
 0x1b2   :  { %719 = vbcast.lane.b32.xlu0 %v717_v51, 256  ;;  %v2156_v60 = vpop.permute.xlu1 %593  ;;  %v2162_v0 = vpop.permute.xlu0 %628 }
 0x1b6   :  { %v2160_v63 = vpop.permute.xlu1 %670  ;;  %v2166_v2 = vpop.permute.xlu0 %635 }
 0x1ba   :  { %v2164_v1 = vpop.permute.xlu1 %600  ;;  %v2170_v4 = vpop.permute.xlu0 %677 }
 0x1be   :  { %v2168_v3 = vpop.permute.xlu1 %684  ;;  %v2174_v11 = vpop.permute.xlu0 %642 }
 0x1c2   :  { %v2172_v5 = vpop.permute.xlu1 %649  ;;  %v2176_v15 = vpop.permute.xlu0 %607 }
 0x1c6   :  { %v657_v12 = vpop.permute.xlu1 %656  ;;  %v2178_v20 = vpop.permute.xlu0 %691 }
 0x1ca   :  { %v699_v9 = vpop.permute.xlu0 %698 }
 0x201   :  { %v483_v16 = vpop.xlane.xlu1 %482 }
 0x202   :  { %v489_v18 = vmax.f32 %v483_v16, 0.0 }
 0x205   :  { %v486_v29 = vpop.xlane.xlu0 %485 }
 0x206   :  { %v490_v35 = vmax.f32 %v486_v29, 0.0 }
 0x215   :  { %v317_v17 = vpop.xlane.xlu1 %316 }
 0x216   :  { %v487_v19 = vmax.f32 %v317_v17, 0.0 }
 0x218   :  { %v2180_v21 = vadd.f32 %v489_v18, %v487_v19 }
 0x21a   :  { %v753_v22 = vmul.f32 %v503_v54, %v2180_v21  ;;  %v754_v23 = vmul.f32 %v510_v52, %v2180_v21  ;;  %v756_v24 = vmul.f32 %v2146_v13, %v2180_v21  ;;  %v755_v25 = vmul.f32 %v517_v39, %v2180_v21 }
 0x21b   :  { %v2188_v26 = vmul.f32 %v657_v12, %v2180_v21  ;;  %v2191_v27 = vmul.f32 %v699_v9, %v2180_v21  ;;  %v762_v31 = vmul.f32 %v566_v59, %v2180_v21  ;;  %v761_v32 = vmul.f32 %v559_v56, %v2180_v21 }
 0x21c   :  { %885 = vperm.xlu0 %1790, %v754_v23   ;;  %882 = vperm.xlu1 %1791, %v753_v22   ;;  %v763_v47 = vmul.f32 %v573_v57, %v2180_v21  ;;  %v764_v7 = vmul.f32 %v580_v46, %v2180_v21  ;;  %v770_v48 = vmul.f32 %v2158_v61, %v2180_v21 }
 0x21d   :  { %v769_v49 = vmul.f32 %v2152_v30, %v2180_v21  ;;  %v759_v19 = vmul.f32 %v2144_v55, %v2180_v21 }
 0x220   :  { %891 = vperm.xlu0 %1790, %v756_v24   ;;  %888 = vperm.xlu1 %1791, %v755_v25   ;;  %v760_v24 = vmul.f32 %v2150_v58, %v2180_v21 }
 0x224   :  { %909 = vperm.xlu0 %1790, %v762_v31   ;;  %906 = vperm.xlu1 %1791, %v761_v32   ;;  %v664_v32 = vpop.permute.xlu1 %663 }
 0x225   :  { %v320_v34 = vpop.xlane.xlu0 %319 }
 0x226   :  { %v488_v36 = vmax.f32 %v320_v34, 0.0 }
 0x228   :  { %v2195_v37 = vadd.f32 %v490_v35, %v488_v36  ;;  %v713_v34 = vpop.permute.xlu1 %712 }
 0x229   :  { %v706_v31 = vpop.permute.xlu0 %705 }
 0x22a   :  { %v785_v38 = vmul.f32 %v503_v54, %v2195_v37  ;;  %v786_v40 = vmul.f32 %v510_v52, %v2195_v37  ;;  %v794_v41 = vmul.f32 %v566_v59, %v2195_v37  ;;  %v793_v42 = vmul.f32 %v559_v56, %v2195_v37 }
 0x22b   :  { %v2202_v43 = vmul.f32 %v657_v12, %v2195_v37  ;;  %v2205_v44 = vmul.f32 %v699_v9, %v2195_v37  ;;  %v787_v45 = vmul.f32 %v517_v39, %v2195_v37  ;;  %v795_v8 = vmul.f32 %v573_v57, %v2195_v37 }
 0x22c   :  { %981 = vperm.xlu0 %1790, %v786_v40   ;;  %978 = vperm.xlu1 %1791, %v785_v38   ;;  %v796_v14 = vmul.f32 %v580_v46, %v2195_v37  ;;  %v788_v50 = vmul.f32 %v2146_v13, %v2195_v37  ;;  %v802_v51 = vmul.f32 %v2158_v61, %v2195_v37 }
 0x22d   :  { %v801_v52 = vmul.f32 %v2152_v30, %v2195_v37  ;;  %v765_v39 = vmul.f32 %v2154_v33, %v2180_v21  ;;  %v757_v54 = vmul.f32 %v2142_v53, %v2180_v21  ;;  %v789_v13 = vmul.f32 %v2142_v53, %v2195_v37  ;;  %v720_v35 = vpop.permute.xlu0 %719 }
 0x22e   :  { %v771_v56 = vmul.f32 %v2162_v0, %v2180_v21  ;;  %v803_v57 = vmul.f32 %v2162_v0, %v2195_v37  ;;  %v797_v30 = vmul.f32 %v2154_v33, %v2195_v37  ;;  %v766_v59 = vmul.f32 %v2156_v60, %v2180_v21 }
 0x22f   :  { %v758_v46 = vmul.f32 %v2148_v28, %v2180_v21  ;;  %v777_v53 = vmul.f32 %v2160_v63, %v2180_v21  ;;  %v772_v61 = vmul.f32 %v2166_v2, %v2180_v21  ;;  %v790_v33 = vmul.f32 %v2148_v28, %v2195_v37 }
 0x230   :  { %1005 = vperm.xlu0 %1790, %v794_v41   ;;  %1002 = vperm.xlu1 %1791, %v793_v42   ;;  %v778_v0 = vmul.f32 %v2170_v4, %v2180_v21  ;;  %v804_v12 = vmul.f32 %v2166_v2, %v2195_v37  ;;  %v798_v16 = vmul.f32 %v2156_v60, %v2195_v37 }
 0x231   :  { %v810_v17 = vmul.f32 %v2170_v4, %v2195_v37  ;;  %v809_v18 = vmul.f32 %v2160_v63, %v2195_v37  ;;  %v767_v28 = vmul.f32 %v2164_v1, %v2180_v21  ;;  %v779_v60 = vmul.f32 %v2168_v3, %v2180_v21 }
 0x232   :  { %v773_v2 = vmul.f32 %v2174_v11, %v2180_v21  ;;  %v799_v63 = vmul.f32 %v2164_v1, %v2195_v37  ;;  %v791_v4 = vmul.f32 %v2144_v55, %v2195_v37  ;;  %v811_v22 = vmul.f32 %v2168_v3, %v2195_v37 }
 0x233   :  { %v805_v23 = vmul.f32 %v2174_v11, %v2195_v37  ;;  %v768_v9 = vmul.f32 %v2176_v15, %v2180_v21  ;;  %v780_v55 = vmul.f32 %v2178_v20, %v2180_v21  ;;  %v774_v1 = vmul.f32 %v2172_v5, %v2180_v21 }
 0x234   :  { %984 = vperm.xlu0 %1790, %v787_v45   ;;  %912 = vperm.xlu1 %1791, %v763_v47   ;;  %v800_v3 = vmul.f32 %v2176_v15, %v2195_v37  ;;  %v792_v11 = vmul.f32 %v2150_v58, %v2195_v37  ;;  %v812_v25 = vmul.f32 %v2178_v20, %v2195_v37 }
 0x235   :  { %v806_v29 = vmul.f32 %v2172_v5, %v2195_v37  ;;  %v782_v58 = vmul.f32 %v706_v31, %v2180_v21  ;;  %v776_v15 = vmul.f32 %v664_v32, %v2180_v21  ;;  %v814_v5 = vmul.f32 %v706_v31, %v2195_v37 }
 0x236   :  { %v808_v20 = vmul.f32 %v664_v32, %v2195_v37  ;;  %v816_v36 = vmul.f32 %v720_v35, %v2195_v37  ;;  %v784_v38 = vmul.f32 %v720_v35, %v2180_v21 }
 0x238   :  { %915 = vperm.xlu0 %1790, %v764_v7   ;;  %1008 = vperm.xlu1 %1791, %v795_v8  }
 0x23c   :  { %933 = vperm.xlu0 %1790, %v770_v48   ;;  %930 = vperm.xlu1 %1791, %v769_v49  }
 0x240   :  { %1011 = vperm.xlu0 %1790, %v796_v14   ;;  %987 = vperm.xlu1 %1791, %v788_v50  }
 0x244   :  { %1029 = vperm.xlu0 %1790, %v802_v51   ;;  %1026 = vperm.xlu1 %1791, %v801_v52  }
 0x248   :  { %918 = vperm.xlu0 %1790, %v765_v39   ;;  %894 = vperm.xlu1 %1791, %v757_v54  }
 0x24c   :  { %990 = vperm.xlu0 %1790, %v789_v13   ;;  %936 = vperm.xlu1 %1791, %v771_v56  }
 0x250   :  { %1032 = vperm.xlu0 %1790, %v803_v57   ;;  %1014 = vperm.xlu1 %1791, %v797_v30  }
 0x254   :  { %921 = vperm.xlu0 %1790, %v766_v59   ;;  %897 = vperm.xlu1 %1791, %v758_v46  }
 0x258   :  { %954 = vperm.xlu0 %1790, %v777_v53   ;;  %939 = vperm.xlu1 %1791, %v772_v61  }
 0x25c   :  { %993 = vperm.xlu0 %1790, %v790_v33   ;;  %957 = vperm.xlu1 %1791, %v778_v0  }
 0x260   :  { %1035 = vperm.xlu0 %1790, %v804_v12   ;;  %1017 = vperm.xlu1 %1791, %v798_v16  }
 0x264   :  { %1053 = vperm.xlu0 %1790, %v810_v17   ;;  %1050 = vperm.xlu1 %1791, %v809_v18  }
 0x268   :  { %924 = vperm.xlu0 %1790, %v767_v28   ;;  %900 = vperm.xlu1 %1791, %v759_v19  }
 0x26c   :  { %960 = vperm.xlu0 %1790, %v779_v60   ;;  %942 = vperm.xlu1 %1791, %v773_v2  }
 0x270   :  { %1020 = vperm.xlu0 %1790, %v799_v63   ;;  %996 = vperm.xlu1 %1791, %v791_v4  }
 0x274   :  { %1056 = vperm.xlu0 %1790, %v811_v22   ;;  %1038 = vperm.xlu1 %1791, %v805_v23  }
 0x278   :  { %927 = vperm.xlu0 %1790, %v768_v9   ;;  %903 = vperm.xlu1 %1791, %v760_v24  }
 0x27c   :  { %963 = vperm.xlu0 %1790, %v780_v55   ;;  %945 = vperm.xlu1 %1791, %v774_v1  }
 0x280   :  { %1023 = vperm.xlu0 %1790, %v800_v3   ;;  %999 = vperm.xlu1 %1791, %v792_v11  }
 0x284   :  { %1059 = vperm.xlu0 %1790, %v812_v25   ;;  %1041 = vperm.xlu1 %1791, %v806_v29  }
 0x288   :  { %966 = vperm.xlu0 %1790, %v2191_v27   ;;  %948 = vperm.xlu1 %1791, %v2188_v26   ;;  %v815_v26 = vmul.f32 %v713_v34, %v2195_v37  ;;  %v783_v27 = vmul.f32 %v713_v34, %v2180_v21 }
 0x28c   :  { %1062 = vperm.xlu0 %1790, %v2205_v44   ;;  %1044 = vperm.xlu1 %1791, %v2202_v43  }
 0x290   :  { %969 = vperm.xlu0 %1790, %v782_v58   ;;  %951 = vperm.xlu1 %1791, %v776_v15  }
 0x294   :  { %1065 = vperm.xlu0 %1790, %v814_v5   ;;  %1047 = vperm.xlu1 %1791, %v808_v20  }
 0x298   :  { %1068 = vperm.xlu0 %1790, %v815_v26   ;;  %972 = vperm.xlu1 %1791, %v783_v27  }
 0x29b   :  { %v886_v40 = vpop.permute.xlu0 %885  ;;  %v883_v41 = vpop.permute.xlu1 %882 }
 0x29c   :  { %v1080_v42 = vrot.slane %v886_v40, %v2059_v6  ;;  %1071 = vperm.xlu0 %1790, %v816_v36   ;;  %v1076_v43 = vrot.slane %v883_v41, %v2059_v6  ;;  %975 = vperm.xlu1 %1791, %v784_v38  }
 0x29e   :  { %v1329_v44 = vsel %vm309_vm3, %v1080_v42, %v1076_v43 }
 0x29f   :  { %v892_v45 = vpop.permute.xlu0 %891  ;;  %v889_v47 = vpop.permute.xlu1 %888 }
 0x2a0   :  { %v1088_v7 = vrot.slane %v892_v45, %v2059_v6  ;;  %v1084_v8 = vrot.slane %v889_v47, %v2059_v6 }
 0x2a2   :  { %v1331_v21 = vsel %vm1330_vm5, %v1084_v8, %v1329_v44 }
 0x2a3   :  { %v910_v37 = vpop.permute.xlu0 %909  ;;  %v2305_v48 = vsel %vm1332_vm6, %v1088_v7, %v1331_v21  ;;  %v907_v49 = vpop.permute.xlu1 %906 }
 0x2a4   :  { %v1112_v14 = vrot.slane %v910_v37, %v2059_v6  ;;  %v1108_v50 = vrot.slane %v907_v49, %v2059_v6 }
 0x2a6   :  { %v2310_v51 = vsel %vm309_vm3, %v1112_v14, %v1108_v50 }
 0x2ab   :  { %v982_v52 = vpop.permute.xlu0 %981  ;;  %v979_v39 = vpop.permute.xlu1 %978 }
 0x2ac   :  { %v1208_v54 = vrot.slane %v982_v52, %v2059_v6  ;;  %v1204_v13 = vrot.slane %v979_v39, %v2059_v6 }
 0x2ae   :  { %v1363_v56 = vsel %vm309_vm3, %v1208_v54, %v1204_v13 }
 0x2af   :  { %v1006_v57 = vpop.permute.xlu0 %1005  ;;  %v1003_v30 = vpop.permute.xlu1 %1002 }
 0x2b0   :  { %v1240_v59 = vrot.slane %v1006_v57, %v2059_v6  ;;  %v1236_v46 = vrot.slane %v1003_v30, %v2059_v6 }
 0x2b2   :  { %v1370_v53 = vsel %vm309_vm3, %v1240_v59, %v1236_v46 }
 0x2b3   :  { %v985_v61 = vpop.permute.xlu0 %984  ;;  %v913_v33 = vpop.permute.xlu1 %912 }
 0x2b4   :  { %v1212_v0 = vrot.slane %v985_v61, %v2059_v6  ;;  %v1116_v49 = vrot.slane %v913_v33, %v2059_v6 }
 0x2b6   :  { %v2320_v12 = vsel %vm1330_vm5, %v1212_v0, %v1363_v56  ;;  %v1343_v56 = vsel %vm1330_vm5, %v1116_v49, %v2310_v51 }
 0x2b7   :  { %v916_v16 = vpop.permute.xlu0 %915  ;;  %v1009_v17 = vpop.permute.xlu1 %1008 }
 0x2b8   :  { %v1244_v18 = vrot.slane %v1009_v17, %v2059_v6  ;;  %v1120_v14 = vrot.slane %v916_v16, %v2059_v6 }
 0x2ba   :  { %v1371_v28 = vsel %vm1330_vm5, %v1244_v18, %v1370_v53  ;;  %v1344_v59 = vsel %vm1332_vm6, %v1120_v14, %v1343_v56 }
 0x2bb   :  { %v934_v19 = vpop.permute.xlu0 %933  ;;  %v931_v60 = vpop.permute.xlu1 %930 }
 0x2bc   :  { %v1144_v2 = vrot.slane %v934_v19, %v2059_v6  ;;  %v1140_v63 = vrot.slane %v931_v60, %v2059_v6 }
 0x2be   :  { %v2327_v4 = vsel %vm309_vm3, %v1144_v2, %v1140_v63 }
 0x2bf   :  { %v1012_v22 = vpop.permute.xlu0 %1011  ;;  %v2329_v23 = vpop.permute.xlu1 %987 }
 0x2c0   :  { %v1248_v9 = vrot.slane %v1012_v22, %v2059_v6  ;;  %v1216_v2 = vrot.slane %v2329_v23, %v2059_v6 }
 0x2c2   :  { %v2333_v24 = vsel %vm1332_vm6, %v1248_v9, %v1371_v28 }
 0x2c3   :  { %v1030_v55 = vpop.permute.xlu0 %1029  ;;  %v1027_v1 = vpop.permute.xlu1 %1026 }
 0x2c4   :  { %v1272_v3 = vrot.slane %v1030_v55, %v2059_v6  ;;  %v1268_v11 = vrot.slane %v1027_v1, %v2059_v6 }
 0x2c6   :  { %v1377_v25 = vsel %vm309_vm3, %v1272_v3, %v1268_v11 }
 0x2c7   :  { %v919_v29 = vpop.permute.xlu0 %918  ;;  %v895_v31 = vpop.permute.xlu1 %894 }
 0x2c8   :  { %v1124_v50 = vrot.slane %v919_v29, %v2059_v6  ;;  %v1092_v39 = vrot.slane %v895_v31, %v2059_v6 }
 0x2ca   :  { %v1345_v53 = vsel %vm1334_vm7, %v1124_v50, %v1344_v59  ;;  %v1335_v33 = vsel %vm1334_vm7, %v1092_v39, %v2305_v48 }
 0x2cb   :  { %v2338_v32 = vpop.permute.xlu0 %990  ;;  %v2340_v58 = vpop.permute.xlu1 %936 }
 0x2cc   :  { %v1220_v9 = vrot.slane %v2338_v32, %v2059_v6 }
 0x2cf   :  { %v1033_v15 = vpop.permute.xlu0 %1032  ;;  %v2342_v5 = vpop.permute.xlu1 %1014 }
 0x2d0   :  { %v1276_v20 = vrot.slane %v1033_v15, %v2059_v6  ;;  %v1252_v11 = vrot.slane %v2342_v5, %v2059_v6 }
 0x2d2   :  { %v2346_v34 = vsel %vm1330_vm5, %v1276_v20, %v1377_v25  ;;  %v1365_v25 = vsel %vm1332_vm6, %v1216_v2, %v2320_v12  ;;  %v1373_v5 = vsel %vm1334_vm7, %v1252_v11, %v2333_v24 }
 0x2d3   :  { %v922_v26 = vpop.permute.xlu0 %921  ;;  %v898_v27 = vpop.permute.xlu1 %897  ;;  %v1366_v32 = vsel %vm1334_vm7, %v1220_v9, %v1365_v25 }
 0x2d4   :  { %v1128_v54 = vrot.slane %v922_v26, %v2059_v6  ;;  %v1096_v57 = vrot.slane %v898_v27, %v2059_v6 }
 0x2d6   :  { %v1346_v0 = vsel %vm1336_vm8, %v1128_v54, %v1345_v53  ;;  %v1337_v17 = vsel %vm1336_vm8, %v1096_v57, %v1335_v33  ;;  %v1148_v54 = vrot.slane %v2340_v58, %v2059_v6 }
 0x2d7   :  { %v2348_v35 = vpop.permute.xlu0 %954  ;;  %v2350_v36 = vpop.permute.xlu1 %939 }
 0x2d8   :  { %v1152_v56 = vrot.slane %v2350_v36, %v2059_v6  ;;  %v1350_v53 = vsel %vm1330_vm5, %v1148_v54, %v2327_v4 }
 0x2da   :  { %v1351_v33 = vsel %vm1332_vm6, %v1152_v56, %v1350_v53 }
 0x2db   :  { %v994_v38 = vpop.permute.xlu0 %993  ;;  %v2352_v40 = vpop.permute.xlu1 %957 }
 0x2dc   :  { %v1224_v3 = vrot.slane %v994_v38, %v2059_v6 }
 0x2de   :  { %v1367_v26 = vsel %vm1336_vm8, %v1224_v3, %v1366_v32 }
 0x2df   :  { %v2354_v41 = vpop.permute.xlu0 %1035  ;;  %v1018_v42 = vpop.permute.xlu1 %1017 }
 0x2e0   :  { %v1256_v29 = vrot.slane %v1018_v42, %v2059_v6  ;;  %v1280_v58 = vrot.slane %v2354_v41, %v2059_v6 }
 0x2e2   :  { %v1374_v12 = vsel %vm1336_vm8, %v1256_v29, %v1373_v5  ;;  %v1379_v41 = vsel %vm1332_vm6, %v1280_v58, %v2346_v34 }
 0x2e3   :  { %v2356_v43 = vpop.permute.xlu0 %1053  ;;  %v2358_v44 = vpop.permute.xlu1 %1050 }
 0x2e4   :  { %v1304_v2 = vrot.slane %v2356_v43, %v2059_v6 }
 0x2e7   :  { %v925_v45 = vpop.permute.xlu0 %924  ;;  %v901_v47 = vpop.permute.xlu1 %900 }
 0x2e8   :  { %v1132_v30 = vrot.slane %v925_v45, %v2059_v6  ;;  %v1100_v46 = vrot.slane %v901_v47, %v2059_v6 }
 0x2ea   :  { %v1347_v28 = vsel %vm1338_vm9, %v1132_v30, %v1346_v0  ;;  %v1339_v19 = vsel %vm1338_vm9, %v1100_v46, %v1337_v17 }
 0x2eb   :  { %v2360_v7 = vpop.permute.xlu0 %960  ;;  %v2362_v8 = vpop.permute.xlu1 %942 }
 0x2ec   :  { %v1156_v30 = vrot.slane %v2362_v8, %v2059_v6 }
 0x2ee   :  { %v1352_v36 = vsel %vm1334_vm7, %v1156_v30, %v1351_v33 }
 0x2ef   :  { %v1021_v21 = vpop.permute.xlu0 %1020  ;;  %v997_v37 = vpop.permute.xlu1 %996 }
 0x2f0   :  { %v1228_v23 = vrot.slane %v997_v37, %v2059_v6  ;;  %v1260_v15 = vrot.slane %v1021_v21, %v2059_v6 }
 0x2f2   :  { %v1368_v45 = vsel %vm1338_vm9, %v1228_v23, %v1367_v26  ;;  %v1375_v49 = vsel %vm1338_vm9, %v1260_v15, %v1374_v12  ;;  %v1172_v23 = vrot.slane %v2348_v35, %v2059_v6 }
 0x2f3   :  { %v2367_v52 = vpop.permute.xlu0 %1056  ;;  %v2371_v13 = vpop.permute.xlu1 %1038 }
 0x2f4   :  { %v1308_v34 = vrot.slane %v2367_v52, %v2059_v6 }
 0x2f7   :  { %v928_v61 = vpop.permute.xlu0 %927  ;;  %v904_v51 = vpop.permute.xlu1 %903 }
 0x2f8   :  { %v1136_v16 = vrot.slane %v928_v61, %v2059_v6  ;;  %v1104_v18 = vrot.slane %v904_v51, %v2059_v6  ;;  %v1284_v51 = vrot.slane %v2371_v13, %v2059_v6  ;;  %v1300_v13 = vrot.slane %v2358_v44, %v2059_v6 }
 0x2f9   :  { %v1180_v44 = vrot.slane %v2360_v7, %v2059_v6 }
 0x2fa   :  { %v1348_v60 = vsel %vm1340_vm10, %v1136_v16, %v1347_v28  ;;  %v1341_v63 = vsel %vm1340_vm10, %v1104_v18, %v1339_v19 }
 0x2fb   :  { %v2391_v48 = vpop.permute.xlu0 %963  ;;  %v1403_v22 = vsel %vm1399_vm11, %v1348_v60, 0.0  ;;  %v946_v55 = vpop.permute.xlu1 %945  ;;  %v1400_v1 = vsel %vm1399_vm11, %v1341_v63, 0.0  ;;  %v1380_v63 = vsel %vm1334_vm7, %v1284_v51, %v1379_v41 }
 0x2fc   :  { %1404 = vadd.xlane.f32.xlu0 %v1403_v22  ;;  %1401 = vadd.xlane.f32.xlu1 %v1400_v1  ;;  %v1160_v46 = vrot.slane %v946_v55, %v2059_v6  ;;  %v1176_v55 = vrot.slane %v2352_v40, %v2059_v6  ;;  %v1184_v40 = vrot.slane %v2391_v48, %v2059_v6 }
 0x2fe   :  { %v1353_v16 = vsel %vm1336_vm8, %v1160_v46, %v1352_v36  ;;  %v1356_v26 = vsel %vm309_vm3, %v1176_v55, %v1172_v23 }
 0x2ff   :  { %v1024_v31 = vpop.permute.xlu0 %1023  ;;  %v1000_v20 = vpop.permute.xlu1 %999 }
 0x300   :  { %v1232_v27 = vrot.slane %v1000_v20, %v2059_v6  ;;  %v1264_v38 = vrot.slane %v1024_v31, %v2059_v6  ;;  %v1384_v31 = vsel %vm309_vm3, %v1304_v2, %v1300_v13 }
 0x301   :  { %v1385_v35 = vsel %vm1330_vm5, %v1308_v34, %v1384_v31 }
 0x302   :  { %v1369_v47 = vsel %vm1340_vm10, %v1232_v27, %v1368_v45  ;;  %v1376_v14 = vsel %vm1340_vm10, %v1264_v38, %v1375_v49  ;;  %v1357_v38 = vsel %vm1330_vm5, %v1180_v44, %v1356_v26  ;;  %v1833_v26 = vld [vmem:[#allocation2] sm:$0xff] }
 0x303   :  { %v2414_v42 = vpop.permute.xlu0 %1059  ;;  %v1042_v37 = vpop.permute.xlu1 %1041  ;;  %v1412_v21 = vsel %vm1399_vm11, %v1369_v47, 0.0  ;;  %v1415_v24 = vsel %vm1399_vm11, %v1376_v14, 0.0  ;;  %v1358_v12 = vsel %vm1332_vm6, %v1184_v40, %v1357_v38  ;;  %v1835_v38 = vld [vmem:[#allocation2 + $0x20] sm:$0xff] }
 0x304   :  { %1413 = vadd.xlane.f32.xlu0 %v1412_v21  ;;  %v1288_v17 = vrot.slane %v1042_v37, %v2059_v6  ;;  %v1312_v43 = vrot.slane %v2414_v42, %v2059_v6 }
 0x306   :  { %v1381_v1 = vsel %vm1336_vm8, %v1288_v17, %v1380_v63  ;;  %v1386_v5 = vsel %vm1332_vm6, %v1312_v43, %v1385_v35 }
 0x307   :  { %v967_v50 = vpop.permute.xlu0 %966  ;;  %v949_v39 = vpop.permute.xlu1 %948 }
 0x308   :  { %1416 = vadd.xlane.f32.xlu0 %v1415_v24  ;;  %v1164_v61 = vrot.slane %v949_v39, %v2059_v6  ;;  %v1188_v7 = vrot.slane %v967_v50, %v2059_v6 }
 0x30a   :  { %v1354_v28 = vsel %vm1338_vm9, %v1164_v61, %v1353_v16  ;;  %v1359_v37 = vsel %vm1334_vm7, %v1188_v7, %v1358_v12 }
 0x30b   :  { %v1063_v57 = vpop.permute.xlu0 %1062  ;;  %v1045_v59 = vpop.permute.xlu1 %1044 }
 0x30c   :  { %v1292_v18 = vrot.slane %v1045_v59, %v2059_v6  ;;  %v1316_v52 = vrot.slane %v1063_v57, %v2059_v6 }
 0x30e   :  { %v1382_v11 = vsel %vm1338_vm9, %v1292_v18, %v1381_v1  ;;  %v1387_v42 = vsel %vm1334_vm7, %v1316_v52, %v1386_v5 }
 0x30f   :  { %v970_v0 = vpop.permute.xlu0 %969  ;;  %v952_v8 = vpop.permute.xlu1 %951 }
 0x310   :  { %v1168_v4 = vrot.slane %v952_v8, %v2059_v6  ;;  %v1192_v48 = vrot.slane %v970_v0, %v2059_v6 }
 0x312   :  { %v1355_v60 = vsel %vm1340_vm10, %v1168_v4, %v1354_v28  ;;  %v1360_v50 = vsel %vm1336_vm8, %v1192_v48, %v1359_v37  ;;  %v1834_v48 = vld [vmem:[#allocation2 + $0x8] sm:$0xff] }
 0x313   :  { %v1066_v19 = vpop.permute.xlu0 %1065  ;;  %v1048_v22 = vpop.permute.xlu1 %1047  ;;  %v1406_v9 = vsel %vm1399_vm11, %v1355_v60, 0.0 }
 0x314   :  { %v1296_v3 = vrot.slane %v1048_v22, %v2059_v6  ;;  %1407 = vadd.xlane.f32.xlu1 %v1406_v9  ;;  %v1320_v32 = vrot.slane %v1066_v19, %v2059_v6 }
 0x316   :  { %v1383_v29 = vsel %vm1340_vm10, %v1296_v3, %v1382_v11  ;;  %v1388_v21 = vsel %vm1336_vm8, %v1320_v32, %v1387_v42  ;;  %v1837_v42 = vld [vmem:[#allocation2 + $0x10] sm:$0xff] }
 0x317   :  { %v1069_v25 = vpop.permute.xlu0 %1068  ;;  %v973_v15 = vpop.permute.xlu1 %972  ;;  %v1418_v20 = vsel %vm1399_vm11, %v1383_v29, 0.0 }
 0x318   :  { %v1324_v27 = vrot.slane %v1069_v25, %v2059_v6  ;;  %1419 = vadd.xlane.f32.xlu0 %v1418_v20  ;;  %v1196_v45 = vrot.slane %v973_v15, %v2059_v6  ;;  %v1832_v15 = vld [vmem:[#allocation2 + $0x28] sm:$0xff] }
 0x31a   :  { %v1389_v24 = vsel %vm1338_vm9, %v1324_v27, %v1388_v21  ;;  %v1361_v54 = vsel %vm1338_vm9, %v1196_v45, %v1360_v50  ;;  %v1836_v45 = vld [vmem:[#allocation2 + $0x30] sm:$0xff] }
 0x31b   :  { %v1072_v47 = vpop.permute.xlu0 %1071  ;;  %v976_v49 = vpop.permute.xlu1 %975 }
 0x31c   :  { %v1328_v14 = vrot.slane %v1072_v47, %v2059_v6  ;;  %v1200_v39 = vrot.slane %v976_v49, %v2059_v6 }
 0x31e   :  { %v1390_v56 = vsel %vm1340_vm10, %v1328_v14, %v1389_v24  ;;  %v1362_v57 = vsel %vm1340_vm10, %v1200_v39, %v1361_v54  ;;  %v1838_v39 = vld [vmem:[#allocation2 + $0x38] sm:$0xff] }
 0x31f   :  { %v1421_v30 = vsel %vm1399_vm11, %v1390_v56, 0.0  ;;  %v1409_v59 = vsel %vm1399_vm11, %v1362_v57, 0.0  ;;  %v1839_v56 = vld [vmem:[#allocation2 + $0x18] sm:$0xff] }
 0x320   :  { %1422 = vadd.xlane.f32.xlu0 %v1421_v30  ;;  %1410 = vadd.xlane.f32.xlu1 %v1409_v59 }
 0x389   :  { %v1405_v46 = vpop.xlane.xlu0 %1404  ;;  %v1402_v61 = vpop.xlane.xlu1 %1401 }
 0x38a   :  { %v1756_v58 = vmul.f32 -1.442695, %v1405_v46  ;;  %v1755_v6 = vmul.f32 -1.442695, %v1402_v61 }
 0x38c   :  { %1792 = vpow2.f32 %v1756_v58 }
 0x38d   :  { %1794 = vpow2.f32 %v1755_v6 }
 0x391   :  { %v1414_v53 = vpop.xlane.xlu0 %1413 }
 0x392   :  { %v1759_v36 = vmul.f32 -1.442695, %v1414_v53 }
 0x395   :  { %v1417_v33 = vpop.xlane.xlu0 %1416 }
 0x396   :  { %v1760_v0 = vmul.f32 -1.442695, %v1417_v33  ;;  %v1793_v4 = vpop.eup %1792 }
 0x397   :  { %v1795_v18 = vpop.eup %1794  ;;  %v1449_v2 = vadd.f32 1.0, %v1793_v4 }
 0x398   :  { %1796 = vpow2.f32 %v1760_v0  ;;  %v1448_v22 = vadd.f32 1.0, %v1795_v18 }
 0x399   :  { %1798 = vpow2.f32 %v1759_v36 }
 0x3a1   :  { %v1408_v51 = vpop.xlane.xlu1 %1407 }
 0x3a2   :  { %v1757_v8 = vmul.f32 -1.442695, %v1408_v51  ;;  %v1797_v41 = vpop.eup %1796 }
 0x3a3   :  { %v1799_v13 = vpop.eup %1798  ;;  %v1453_v55 = vadd.f32 1.0, %v1797_v41 }
 0x3a4   :  { %1800 = vpow2.f32 %v1757_v8  ;;  %v1452_v34 = vadd.f32 1.0, %v1799_v13 }
 0x3a5   :  { %v1420_v16 = vpop.xlane.xlu0 %1419 }
 0x3a6   :  { %v1761_v17 = vmul.f32 -1.442695, %v1420_v16 }
 0x3a8   :  { %1802 = vpow2.f32 %v1761_v17 }
 0x3ad   :  { %v1423_v28 = vpop.xlane.xlu0 %1422  ;;  %v1411_v19 = vpop.xlane.xlu1 %1410 }
 0x3ae   :  { %v1762_v60 = vmul.f32 -1.442695, %v1423_v28  ;;  %v1758_v63 = vmul.f32 -1.442695, %v1411_v19  ;;  %v1801_v9 = vpop.eup %1800 }
 0x3af   :  { %v1450_v3 = vadd.f32 1.0, %v1801_v9 }
 0x3b0   :  { %1804 = vpow2.f32 %v1762_v60 }
 0x3b1   :  { %1806 = vpow2.f32 %v1758_v63 }
 0x3b2   :  { %v1803_v1 = vpop.eup %1802  ;;  %1808 = vrcp.f32 %v1449_v2 }
 0x3b3   :  { %1810 = vrcp.f32 %v1448_v22  ;;  %v1454_v44 = vadd.f32 1.0, %v1803_v1 }
 0x3b4   :  { %1812 = vrcp.f32 %v1453_v55 }
 0x3b5   :  { %1814 = vrcp.f32 %v1452_v34 }
 0x3b6   :  { %1816 = vrcp.f32 %v1454_v44 }
 0x3b7   :  { %1818 = vrcp.f32 %v1450_v3 }
 0x3ba   :  { %v1805_v43 = vpop.eup %1804 }
 0x3bb   :  { %v1807_v11 = vpop.eup %1806  ;;  %v1455_v23 = vadd.f32 1.0, %v1805_v43 }
 0x3bc   :  { %v1451_v40 = vadd.f32 1.0, %v1807_v11  ;;  %v1809_v52 = vpop.eup %1808 }
 0x3bd   :  { %1820 = vrcp.f32 %v1455_v23  ;;  %v1811_v25 = vpop.eup %1810  ;;  %v2496_v27 = vmul.f32 %v1834_v48, %v1809_v52  ;;  %v1584_v48 = vstv %s2534_s23 }
 0x3be   :  { %1822 = vrcp.f32 %v1451_v40  ;;  %v1813_v29 = vpop.eup %1812  ;;  %v2494_v35 = vmul.f32 %v1833_v26, %v1811_v25  ;;  %v1557_v26 = vstv %s2532_s22 }
 0x3bf   :  { %v1815_v31 = vpop.eup %1814  ;;  %v2492_v20 = vmul.f32 %v1832_v15, %v1813_v29  ;;  %v1530_v29 = vstv %s1763_s20 }
 0x3c0   :  { %v1817_v7 = vpop.eup %1816  ;;  %v2498_v5 = vmul.f32 %v1835_v38, %v1815_v31  ;;  %v1480_v49 = vadd.f32 %v2496_v27, %v2494_v35 }
 0x3c1   :  { %v1819_v32 = vpop.eup %1818  ;;  %v2500_v12 = vmul.f32 %v1836_v45, %v1817_v7  ;;  %v1607_v7 = vstv %s1769_s21 }
 0x3c2   :  { %v2502_v47 = vmul.f32 %v1837_v42, %v1819_v32  ;;  %v1489_v37 = vadd.f32 %v2492_v20, %v2498_v5  ;;  %v1603_v42 = vstv %s2536_s24 }
 0x3c3   :  { %v1509_v30 = vmax.f32 %v2498_v5, %v2500_v12 }
 0x3c4   :  { %v1490_v50 = vadd.f32 %v1489_v37, %v2500_v12  ;;  %v1481_v54 = vadd.f32 %v1480_v49, %v2502_v47  ;;  %v1500_v53 = vmax.f32 %v2494_v35, %v2502_v47  ;;  %v1526_v37 = vstv %s2538_s25 }
 0x3c7   :  { %v1821_v21 = vpop.eup %1820 }
 0x3c8   :  { %v1823_v14 = vpop.eup %1822  ;;  %v2509_v24 = vmul.f32 %v1838_v39, %v1821_v21 }
 0x3c9   :  { %v2512_v57 = vmul.f32 %v1839_v56, %v1823_v14 }
 0x3ca   :  { %v1491_v59 = vadd.f32 %v1490_v50, %v2509_v24  ;;  %v1510_v46 = vmax.f32 %v2492_v20, %v2509_v24  ;;  %v1553_v50 = vstv %s2540_s26 }
 0x3cb   :  { %v1482_v61 = vadd.f32 %v1481_v54, %v2512_v57  ;;  %v1501_v33 = vmax.f32 %v2496_v27, %v2512_v57 }
 0x3cc   :  { %v1492_v58 = vrot.slane %v1491_v59, 4  ;;  %v1511_v6 = vmax.f32 %v1509_v30, %v1510_v46  ;;  %v1580_v30 = vstv %s2542_s27 }
 0x3cd   :  { %v1483_v0 = vrot.slane %v1482_v61, 4  ;;  %v1502_v36 = vmax.f32 %v1500_v53, %v1501_v33 }
 0x3ce   :  { %v1493_v51 = vadd.f32 %v1492_v58, %v1491_v59  ;;  %v1512_v8 = vrot.slane %v1511_v6, 4  ;;  %v1629_v59 = vstv %s2544_s29 }
 0x3cf   :  { %v1484_v16 = vadd.f32 %v1483_v0, %v1482_v61  ;;  %v1503_v17 = vrot.slane %v1502_v36, 4  ;;  %v1625_v61 = vstv %s2546_s30 }
 0x3d0   :  { %v1494_v4 = vrot.slane %v1493_v51, 2  ;;  %v1513_v18 = vmax.f32 %v1511_v6, %v1512_v8 }
 0x3d1   :  { %v1485_v28 = vrot.slane %v1484_v16, 2  ;;  %v1504_v41 = vmax.f32 %v1502_v36, %v1503_v17 }
 0x3d2   :  { %v1495_v19 = vadd.f32 %v1494_v4, %v1493_v51  ;;  %v1514_v60 = vrot.slane %v1513_v18, 2  ;;  %v1656_v51 = vstv %s2548_s5 }
 0x3d3   :  { %v1486_v13 = vadd.f32 %v1485_v28, %v1484_v16  ;;  %v1505_v2 = vrot.slane %v1504_v41, 2 }
 0x3d4   :  { %v1496_v63 = vrot.slane %v1495_v19, 1  ;;  %v1515_v22 = vmax.f32 %v1513_v18, %v1514_v60 }
 0x3d5   :  { %v1487_v9 = vrot.slane %v1486_v13, 1  ;;  %v1506_v55 = vmax.f32 %v1504_v41, %v1505_v2 }
 0x3d6   :  { %v1497_v34 = vadd.f32 %v1496_v63, %v1495_v19  ;;  %v1516_v1 = vrot.slane %v1515_v22, 1 }
 0x3d7   :  { %v1488_v3 = vadd.f32 %v1487_v9, %v1486_v13  ;;  %v1507_v44 = vrot.slane %v1506_v55, 1 }
 0x3d8   :  { %v1499_v43 = vmul.f32 0.03125, %v1497_v34  ;;  %v1517_v11 = vmax.f32 %v1515_v22, %v1516_v1  ;;  %v1652_v34 = vstv %s2555_s6 }
 0x3d9   :  { %v1498_v23 = vmul.f32 0.03125, %v1488_v3  ;;  %v1508_v40 = vmax.f32 %v1506_v55, %v1507_v44  ;;  %v1683_v3 = vstv %s2560_s0 }
 0x3da   :  { %v1520_v52 = vsel %vm1518_vm12, %v1499_v43, %v1517_v11 }
 0x3db   :  { %v2524_v25 = vsel %vm1518_vm12, %v1498_v23, %v1508_v40  ;;  %1523 = vrot.lane.b32.xlu0 %v1520_v52, %s1907_s2  ;;  %v1609_v38 = vmul.f32 %v1607_v7, %v1520_v52  ;;  %v1605_v58 = vmul.f32 %v1603_v42, %v1520_v52 }
 0x3dc   :  { %1521 = vrot.lane.b32.xlu1 %v2524_v25, %s1907_s2  ;;  %v2558_v14 = vmul.f32 %v1607_v7, %v2524_v25 }
 0x3dd   :  { %v1613_v46 = vrot.slane %v1609_v38, 1 }
 0x3de   :  { %v1612_v8 = vrot.slane %v2558_v14, 1 }
 0x3df   :  { %1577 = vrot.lane.b32.xlu0 %v1520_v52, %s1908_s15  ;;  %v1617_v19 = vadd.f32 %v1613_v46, %v1605_v58 }
 0x3e0   :  { %1548 = vrot.lane.b32.xlu1 %v2524_v25, %s1909_s16 }
 0x3e3   :  { %1622 = vrot.lane.b32.xlu0 %v1520_v52, %s1910_s17 }
 0x3e4   :  { %1550 = vrot.lane.b32.xlu1 %v1520_v52, %s1909_s16 }
 0x3e7   :  { %1649 = vrot.lane.b32.xlu0 %v1520_v52, %s1911_s18 }
 0x3e8   :  { %1575 = vrot.lane.b32.xlu1 %v2524_v25, %s1908_s15 }
 0x3eb   :  { %1676 = vrot.lane.b32.xlu0 %v1520_v52, %s1912_s19 }
 0x3ec   :  { %1620 = vrot.lane.b32.xlu1 %v2524_v25, %s1910_s17 }
 0x3f0   :  { %1647 = vrot.lane.b32.xlu1 %v2524_v25, %s1911_s18 }
 0x3f4   :  { %1674 = vrot.lane.b32.xlu1 %v2524_v25, %s1912_s19 }
 0x44d   :  { %v1524_v31 = vpop.permute.xlu0 %1523 }
 0x44e   :  { %v1522_v32 = vpop.permute.xlu1 %1521  ;;  %v1532_v15 = vmul.f32 %v1530_v29, %v1524_v31  ;;  %v1528_v0 = vmul.f32 %v1526_v37, %v1524_v31  ;;  %v1679_v31 = vstv %s2566_s7 }
 0x44f   :  { %v1531_v21 = vmul.f32 %v1530_v29, %v1522_v32  ;;  %v1527_v28 = vmul.f32 %v1526_v37, %v1522_v32 }
 0x450   :  { %v1536_v56 = vrot.slane %v1532_v15, 1 }
 0x451   :  { %v1578_v45 = vpop.permute.xlu0 %1577  ;;  %v1535_v6 = vrot.slane %v1531_v21, 1 }
 0x452   :  { %v1549_v49 = vpop.permute.xlu1 %1548  ;;  %v1586_v54 = vmul.f32 %v1584_v48, %v1578_v45  ;;  %v1540_v41 = vadd.f32 %v1536_v56, %v1528_v0  ;;  %v1582_v13 = vmul.f32 %v1580_v30, %v1578_v45 }
 0x453   :  { %v1558_v39 = vmul.f32 %v1557_v26, %v1549_v49  ;;  %v1554_v16 = vmul.f32 %v1553_v50, %v1549_v49  ;;  %v1539_v9 = vadd.f32 %v1535_v6, %v1527_v28 }
 0x454   :  { %v1590_v17 = vrot.slane %v1586_v54, 1  ;;  %v1545_v40 = vsel %vm1541_vm13, %v1540_v41, 0.0 }
 0x455   :  { %v1562_v53 = vrot.slane %v1558_v39, 1  ;;  %v1623_v33 = vpop.permute.xlu0 %1622  ;;  %v1544_v45 = vsel %vm1541_vm13, %v1539_v9, 0.0 }
 0x456   :  { %v1551_v36 = vpop.permute.xlu1 %1550  ;;  %v1631_v18 = vmul.f32 %v1629_v59, %v1623_v33  ;;  %v1594_v44 = vadd.f32 %v1590_v17, %v1582_v13  ;;  %v1627_v52 = vmul.f32 %v1625_v61, %v1623_v33  ;;  %v1604_v17 = vmul.f32 %v1603_v42, %v2524_v25 }
 0x457   :  { %v1559_v4 = vmul.f32 %v1557_v26, %v1551_v36  ;;  %v1566_v60 = vadd.f32 %v1562_v53, %v1554_v16  ;;  %v1555_v2 = vmul.f32 %v1553_v50, %v1551_v36 }
 0x458   :  { %v1635_v11 = vrot.slane %v1631_v18, 1  ;;  %v1599_v14 = vsel %vm1595_vm15, %v1594_v44, 0.0  ;;  %v1616_v13 = vadd.f32 %v1612_v8, %v1604_v17 }
 0x459   :  { %v1563_v63 = vrot.slane %v1559_v4, 1  ;;  %v1650_v22 = vpop.permute.xlu0 %1649  ;;  %v1571_v7 = vsel %vm1568_vm14, %v1566_v60, 0.0 }
 0x45a   :  { %v1576_v55 = vpop.permute.xlu1 %1575  ;;  %v1658_v1 = vmul.f32 %v1656_v51, %v1650_v22  ;;  %v1639_v50 = vadd.f32 %v1635_v11, %v1627_v52  ;;  %v1573_v56 = vadd.f32 %v1571_v7, %v1544_v45 }
 0x45b   :  { %v1567_v43 = vadd.f32 %v1563_v63, %v1555_v2  ;;  %v1585_v23 = vmul.f32 %v1584_v48, %v1576_v55  ;;  %v1581_v15 = vmul.f32 %v1580_v30, %v1576_v55  ;;  %v1654_v48 = vmul.f32 %v1652_v34, %v1650_v22 }
 0x45c   :  { %v1662_v29 = vrot.slane %v1658_v1, 1 }
 0x45d   :  { %v1572_v32 = vsel %vm1568_vm14, %v1567_v43, 0.0  ;;  %v1589_v26 = vrot.slane %v1585_v23, 1  ;;  %v1677_v38 = vpop.permute.xlu0 %1676 }
 0x45e   :  { %v1574_v37 = vadd.f32 %v1572_v32, %v1545_v40  ;;  %v1621_v21 = vpop.permute.xlu1 %1620  ;;  %v1685_v49 = vmul.f32 %v1683_v3, %v1677_v38  ;;  %v1666_v53 = vadd.f32 %v1662_v29, %v1654_v48  ;;  %v1681_v0 = vmul.f32 %v1679_v31, %v1677_v38 }
 0x45f   :  { %v1593_v39 = vadd.f32 %v1589_v26, %v1581_v15  ;;  %v1630_v54 = vmul.f32 %v1629_v59, %v1621_v21  ;;  %v1626_v58 = vmul.f32 %v1625_v61, %v1621_v21  ;;  %v1644_v59 = vsel %vm1640_vm0, %v1639_v50, 0.0 }
 0x460   :  { %v1601_v46 = vadd.f32 %v1599_v14, %v1574_v37  ;;  %v1689_v30 = vrot.slane %v1685_v49, 1  ;;  %v1671_v61 = vsel %vm1667_vm1, %v1666_v53, 0.0 }
 0x461   :  { %v1598_v33 = vsel %vm1595_vm15, %v1593_v39, 0.0  ;;  %v1634_v6 = vrot.slane %v1630_v54, 1 }
 0x462   :  { %v1619_v36 = vadd.f32 %v1617_v19, %v1601_v46  ;;  %v1600_v16 = vadd.f32 %v1598_v33, %v1573_v56  ;;  %v1648_v4 = vpop.permute.xlu1 %1647  ;;  %v1693_v28 = vadd.f32 %v1689_v30, %v1681_v0 }
 0x463   :  { %v1638_v18 = vadd.f32 %v1634_v6, %v1626_v58  ;;  %v1657_v41 = vmul.f32 %v1656_v51, %v1648_v4  ;;  %v1653_v19 = vmul.f32 %v1652_v34, %v1648_v4 }
 0x464   :  { %v1646_v60 = vadd.f32 %v1644_v59, %v1619_v36  ;;  %v1618_v22 = vadd.f32 %v1616_v13, %v1600_v16  ;;  %v1698_v42 = vsel %vm1694_vm2, %v1693_v28, 0.0 }
 0x465   :  { %v1661_v2 = vrot.slane %v1657_v41, 1  ;;  %v1643_v25 = vsel %vm1640_vm0, %v1638_v18, 0.0 }
 0x466   :  { %v1673_v63 = vadd.f32 %v1671_v61, %v1646_v60  ;;  %v1675_v9 = vpop.permute.xlu1 %1674  ;;  %v1645_v11 = vadd.f32 %v1643_v25, %v1618_v22 }
 0x467   :  { %v1665_v55 = vadd.f32 %v1661_v2, %v1653_v19  ;;  %v1684_v51 = vmul.f32 %v1683_v3, %v1675_v9  ;;  %v1680_v44 = vmul.f32 %v1679_v31, %v1675_v9 }
 0x468   :  { %v1700_v1 = vadd.f32 %v1698_v42, %v1673_v63 }
 0x469   :  { %v1670_v8 = vsel %vm1667_vm1, %v1665_v55, 0.0  ;;  %v1688_v43 = vrot.slane %v1684_v51, 1 }
 0x46a   :  { %v1777_v34 = vmul.f32 -1.442695, %v1700_v1  ;;  %v1672_v40 = vadd.f32 %v1670_v8, %v1645_v11 }
 0x46b   :  { %v1692_v23 = vadd.f32 %v1688_v43, %v1680_v44 }
 0x46c   :  { %1824 = vpow2.f32 %v1777_v34 }
 0x46d   :  { %v1697_v52 = vsel %vm1694_vm2, %v1692_v23, 0.0 }
 0x46e   :  { %v1699_v29 = vadd.f32 %v1697_v52, %v1672_v40 }
 0x470   :  { %v1776_v7 = vmul.f32 -1.442695, %v1699_v29 }
 0x472   :  { %1826 = vpow2.f32 %v1776_v7 }
 0x476   :  { %v1825_v32 = vpop.eup %1824 }
 0x477   :  { %v1708_v15 = vadd.f32 1.0, %v1825_v32 }
 0x479   :  { %1828 = vrcp.f32 %v1708_v15 }
 0x47c   :  { %v1827_v3 = vpop.eup %1826 }
 0x47d   :  { %v1707_v26 = vadd.f32 1.0, %v1827_v3 }
 0x47f   :  { %1830 = vrcp.f32 %v1707_v26 }
 0x483   :  { %v1829_v38 = vpop.eup %1828 }
 0x484   :  { %v1720_v31 = vrot.slane %v1829_v38, %v1961_v10 }
 0x486   :  { %v1725_v45 = vmul.f32 %v1720_v31, %v2498_v5  ;;  %v1726_v37 = vmul.f32 %v1720_v31, %v2492_v20  ;;  %v1727_v48 = vmul.f32 %v1720_v31, %v2500_v12  ;;  %v1728_v62 = vmul.f32 %v1720_v31, %v2509_v24 }
 0x488   :  { %1733 = vst [vmem:[#allocation7 + $0x20] sm:$0xff] %v1725_v45  ;;  %1734 = vst [vmem:[#allocation7 + $0x28] sm:$0xff] %v1726_v37 }
 0x489   :  { %1735 = vst [vmem:[#allocation7 + $0x30] sm:$0xff] %v1727_v48  ;;  %1736 = vst [vmem:[#allocation7 + $0x38] sm:$0xff] %v1728_v62  ;;  %v1831_v21 = vpop.eup %1830 }
 0x48a   :  { %v1716_v49 = vrot.slane %v1831_v21, %v1961_v10 }
 0x48c   :  { %v1721_v14 = vmul.f32 %v1716_v49, %v2494_v35  ;;  %v1722_v50 = vmul.f32 %v1716_v49, %v2496_v27  ;;  %v1723_v5 = vmul.f32 %v1716_v49, %v2502_v47  ;;  %v1724_v20 = vmul.f32 %v1716_v49, %v2512_v57 }
 0x48e   :  { %1729 = vst [vmem:[#allocation7] sm:$0xff] %v1721_v14  ;;  %1730 = vst [vmem:[#allocation7 + $0x8] sm:$0xff] %v1722_v50 }
 0x48f   :  { %1731 = vst [vmem:[#allocation7 + $0x10] sm:$0xff] %v1723_v5  ;;  %1732 = vst [vmem:[#allocation7 + $0x18] sm:$0xff] %v1724_v20 }
 0x490   :  { %1885 = shalt.err (!%p1882_p3)
}
 0x491   :  { %s1886_s12 = scalar_lea.hbm %s2636_s4, 1024 }
 0x492   :  { %p1887_p4 = scmp.ne.s32.totalorder %s2636_s4, %s1886_s12  ;;  %p1890_p5 = scmp.lt.u32.totalorder %s1886_s12, %s2636_s4 }
 0x494   :  { %p1892_p6 = pnand %p1890_p5, %p1887_p4 }
 0x496   :  { %1895 = shalt.err (!%p1892_p6)
}
 0x497   :  { %1748 = dma.vmem_to_hbm [thread:$0]  %s1743_s8, 1024, %s2636_s4, [#allocation4], %s1903_s3, %s1903_s3, %s1904_s28  }
 0x498   :  { %1900 = dma.done.wait [#allocation4], 1024  }
 0x499   :  { %1901 = vsyncadd [#allocation4], 4294966272 }
 0x49a   :  { %1752 = vsyncpa [#allocation3], 1 }
 0x49b   :  { %1753 = vsyncpa [#allocation4], 1 }
 0x49c   :  { %1754 = vsyncpa [#allocation5], 1 }

</bundles_post_ra>
